<compile_context>
chip_gen: v5e
topology: v5e:2x2
jax: 0.10.0
libtpu: 0.0.40
codegen_flags: <defaults>
</compile_context>

<pallas_src>
import jax
import jax.numpy as jnp
from jax import lax
from jax.experimental import pallas as pl
from jax.experimental.pallas import tpu as pltpu

# Problem size (small shapes consistent with the module)
B_BLOCKS = 8          # graph-blocks in the batch
N_NODES = 16          # nodes per dense block
IN_FEATS = 8          # in_features
N_HEADS = 2           # n_heads
HEAD_OUT = 8          # head_out_feats
HID = N_HEADS * HEAD_OUT        # 16
HID_PAD = 128                   # lane-dense padded feature width (compute only)
N_GRAPHS = 2                    # graphs per block
NODES_PER_GRAPH = N_NODES // N_GRAPHS
NEG_SLOPE = 0.2                 # GATConv default negative_slope
NEG_INF = -1e30                 # f32 only (bf16 would saturate)

TOTAL_NODES = B_BLOCKS * N_NODES       # 128
TOTAL_GRAPHS = B_BLOCKS * N_GRAPHS     # 16

# Packed-parameter slab layout (rows of a [16, 128] f32 tile, cols >= HID are 0)
P_ROWS = 16
ROW_WGAT = 0                      # rows 0..7  : w_gat      [F, HID]
ROW_ASRC = ROW_WGAT + IN_FEATS    # rows 8..9  : att_src    block-flat [H, HID]
ROW_ADST = ROW_ASRC + N_HEADS     # row 10     : att_dst    flat [HID]
ROW_BGAT = ROW_ADST + 1           # row 11     : b_gat      [HID]
ROW_WREL = ROW_BGAT + 1           # row 12     : w_rel      [HID]
ROW_WROOT = ROW_WREL + 1          # row 13     : w_root     [HID]
ROW_BREL = ROW_WROOT + 1          # row 14     : b_rel      scalar at col 0


def _default_num_steps():
    """2 grid steps only where there are 2 TensorCores per chip (v7x-like);
    single-TC chips (v5e/v6e) get the whole batch in one step."""
    try:
        kind = jax.devices()[0].device_kind.lower()
    except Exception:
        return 1
    return 2 if ("v7" in kind or "7x" in kind) else 1


def ssi_ddi_kernel(x_ref, adj_ref, p_ref, h_t_ref, emb_ref):
    """One grid step: GATConv -> SAGPooling(min_score=-1) -> global_add_pool
    over a fold of the batch densified into a single node axis."""
    m = x_ref.shape[0]            # nodes in this step (block-diagonal fold)
    g = emb_ref.shape[0]          # graphs in this step

    x = x_ref[...]                # [M, F]
    adj = adj_ref[...]            # [M, M] block-diag, edge j -> i, no self loops
    p = p_ref[...]                # [16, 128] packed parameters

    w_gat = p[ROW_WGAT:ROW_WGAT + IN_FEATS, :]        # [F, 128]
    att_src_rows = p[ROW_ASRC:ROW_ASRC + N_HEADS, :]  # [H, 128] block-flat
    att_dst_flat = p[ROW_ADST:ROW_ADST + 1, :]        # [1, 128]
    b_gat = p[ROW_BGAT:ROW_BGAT + 1, :]               # [1, 128]
    wrd = p[ROW_WREL:ROW_WROOT + 1, :]                # [2, 128] (w_rel ; w_root)
    b_rel = p[ROW_BREL:ROW_BREL + 1, 0:1]             # [1, 1]

    # GATConv adds self loops internally: derive the diagonal in-kernel.
    ri = lax.broadcasted_iota(jnp.int32, (m, m), 0)
    ci = lax.broadcasted_iota(jnp.int32, (m, m), 1)
    mask = jnp.logical_or(adj > 0.0, ri == ci)

    # ---------------- GATConv (both heads, 128-lane padded compute) ----------
    xw = jnp.dot(x, w_gat, preferred_element_type=jnp.float32)          # [M, 128]
    # a_src for BOTH heads with one 2-row MXU dot (block-flat att rows)
    a_src_hn = lax.dot_general(att_src_rows, xw, (((1,), (1,)), ((), ())),
                               preferred_element_type=jnp.float32)      # [H, M]
    # a_dst via VPU broadcast-mul + per-head masked full-width lane reduce
    ad_full = xw * att_dst_flat                                         # [M, 128]

    lane = lax.broadcasted_iota(jnp.int32, (m, HID_PAD), 1)
    head_masks = [
        jnp.logical_and(lane >= hd * HEAD_OUT, lane < (hd + 1) * HEAD_OUT)
        for hd in range(N_HEADS)
    ]

    h = jnp.zeros((m, HID_PAD), jnp.float32)
    for hd in range(N_HEADS):
        in_head = head_masks[hd]
        a_dst_col = jnp.sum(jnp.where(in_head, ad_full, 0.0),
                            axis=1, keepdims=True)                      # [M, 1]
        e = a_dst_col + a_src_hn[hd:hd + 1, :]        # e[i,j] = a_dst[i] + a_src[j]
        e = jnp.where(e > 0, e, NEG_SLOPE * e)        # LeakyReLU(0.2)
        e = jnp.where(mask, e, NEG_INF)               # only real edges j->i
        e = e - jnp.max(e, axis=1, keepdims=True)     # softmax over sources j
        pexp = jnp.exp(e)                             # masked entries underflow to 0
        inv = pl.reciprocal(jnp.sum(pexp, axis=1, keepdims=True), approx=True)
        alpha = pexp * inv                                              # [M, M]
        o = jnp.dot(alpha, xw, preferred_element_type=jnp.float32)      # [M, 128]
        h = jnp.where(in_head, o, h)                  # disjoint lane ranges
    h = h + b_gat                                     # lanes >= HID stay 0

    # Compact, feature-major h: pick the HID real lanes with a tiny selection
    # matmul (MXU) -> [HID, M] lane-dense store, no padding written back.
    sr = lax.broadcasted_iota(jnp.int32, (HID, HID_PAD), 0)
    sc = lax.broadcasted_iota(jnp.int32, (HID, HID_PAD), 1)
    sel = (sr == sc).astype(jnp.float32)                                # [HID, 128]
    h_t = lax.dot_general(sel, h, (((1,), (1,)), ((), ())),
                          preferred_element_type=jnp.float32)           # [HID, M]
    h_t_ref[...] = h_t

    # ---- SAGPooling score: GraphConv as  adj @ (h.w_rel) + h.w_root + b ----
    cd = lax.dot_general(wrd, h, (((1,), (1,)), ((), ())),
                         preferred_element_type=jnp.float32)            # [2, M]
    s_neigh = lax.dot_general(cd[0:1, :], adj, (((1,), (1,)), ((), ())),
                              preferred_element_type=jnp.float32)       # [1, M]
    s_row = s_neigh + cd[1:2, :] + b_rel                                # [1, M]

    # Per-graph softmax (min_score=-1 keeps every node) + global_add_pool.
    # Graph membership derived in-kernel from the contiguous equal-partition
    # node layout (node j belongs to local graph j // NODES_PER_GRAPH).
    gr = lax.broadcasted_iota(jnp.int32, (g, m), 0)
    gc = lax.broadcasted_iota(jnp.int32, (g, m), 1)
    lo = gr * NODES_PER_GRAPH
    gmask = jnp.logical_and(gc >= lo, gc < lo + NODES_PER_GRAPH)        # [G, M]
    s_g = jnp.where(gmask, s_row, NEG_INF)
    s_g = s_g - jnp.max(s_g, axis=1, keepdims=True)
    p_g = jnp.exp(s_g)                                # masked entries -> exactly 0
    inv_g = pl.reciprocal(jnp.sum(p_g, axis=1, keepdims=True), approx=True)
    score = p_g * inv_g                                                 # [G, M]
    emb_ref[...] = lax.dot_general(score, h_t, (((1,), (1,)), ((), ())),
                                   preferred_element_type=jnp.float32)  # [G, HID]


def make_ssi_ddi_block(num_steps):
    assert B_BLOCKS % num_steps == 0
    nodes_per_step = TOTAL_NODES // num_steps
    graphs_per_step = TOTAL_GRAPHS // num_steps

    @jax.jit
    def run(x_steps, adj_bd, pslab):
        # x_steps : [S, M, F]   batch collapsed into the node axis
        # adj_bd  : [S, M, M]   block-diagonal adjacency per step
        # pslab   : [16, 128]   packed parameters (shared across steps)
        return pl.pallas_call(
            ssi_ddi_kernel,
            grid=(num_steps,),
            in_specs=[
                pl.BlockSpec((None, nodes_per_step, IN_FEATS), lambda s: (s, 0, 0)),
                pl.BlockSpec((None, nodes_per_step, nodes_per_step), lambda s: (s, 0, 0)),
                pl.BlockSpec((P_ROWS, HID_PAD), lambda s: (0, 0)),
            ],
            out_specs=(
                pl.BlockSpec((None, HID, nodes_per_step), lambda s: (s, 0, 0)),
                pl.BlockSpec((None, graphs_per_step, HID), lambda s: (s, 0, 0)),
            ),
            out_shape=(
                jax.ShapeDtypeStruct((num_steps, HID, nodes_per_step), jnp.float32),
                jax.ShapeDtypeStruct((num_steps, graphs_per_step, HID), jnp.float32),
            ),
            compiler_params=pltpu.CompilerParams(
                dimension_semantics=("parallel",)),
        )(x_steps, adj_bd, pslab)

    return run


def init_params(key):
    ks = jax.random.split(key, 7)
    s = 0.2
    return {
        # GATConv(in_features, head_out_feats, n_heads)
        "w_gat":   s * jax.random.normal(ks[0], (IN_FEATS, HID), jnp.float32),
        "att_src": s * jax.random.normal(ks[1], (N_HEADS, HEAD_OUT), jnp.float32),
        "att_dst": s * jax.random.normal(ks[2], (N_HEADS, HEAD_OUT), jnp.float32),
        "b_gat":   s * jax.random.normal(ks[3], (1, HID), jnp.float32),
        # SAGPooling GNN = GraphConv(HID, 1): lin_rel (w,b) + lin_root (w, no bias)
        "w_rel":   s * jax.random.normal(ks[4], (1, HID), jnp.float32),
        "b_rel":   s * jax.random.normal(ks[5], (1, 1), jnp.float32),
        "w_root":  s * jax.random.normal(ks[6], (1, HID), jnp.float32),
    }


def pack_params(p):
    """Pack all parameters into a single [16, 128] f32 slab (one DMA)."""
    slab = jnp.zeros((P_ROWS, HID_PAD), jnp.float32)
    slab = slab.at[ROW_WGAT:ROW_WGAT + IN_FEATS, :HID].set(p["w_gat"])
    att_src_rows = jnp.zeros((N_HEADS, HID), jnp.float32)
    for hd in range(N_HEADS):
        att_src_rows = att_src_rows.at[hd, hd * HEAD_OUT:(hd + 1) * HEAD_OUT].set(
            p["att_src"][hd])
    slab = slab.at[ROW_ASRC:ROW_ASRC + N_HEADS, :HID].set(att_src_rows)
    slab = slab.at[ROW_ADST, :HID].set(p["att_dst"].reshape(HID))
    slab = slab.at[ROW_BGAT, :HID].set(p["b_gat"][0])
    slab = slab.at[ROW_WREL, :HID].set(p["w_rel"][0])
    slab = slab.at[ROW_WROOT, :HID].set(p["w_root"][0])
    slab = slab.at[ROW_BREL, 0].set(p["b_rel"][0, 0])
    return slab


def build_graph():
    # Two bidirectional ring graphs of NODES_PER_GRAPH nodes each (per block),
    # nodes laid out as contiguous equal partitions (graph g owns nodes
    # [g*NPG, (g+1)*NPG)) -- the layout the kernel's derived gmask assumes.
    edges = []
    for g in range(N_GRAPHS):
        base = g * NODES_PER_GRAPH
        for i in range(NODES_PER_GRAPH):
            a = base + i
            b = base + (i + 1) % NODES_PER_GRAPH
            edges.append((a, b))
            edges.append((b, a))
    src = jnp.array([e[0] for e in edges], jnp.int32)
    dst = jnp.array([e[1] for e in edges], jnp.int32)
    adj = jnp.zeros((N_NODES, N_NODES), jnp.float32).at[dst, src].set(1.0)  # adj[dst, src]
    batch = jnp.repeat(jnp.arange(N_GRAPHS), NODES_PER_GRAPH)
    bo = (batch[None, :] == jnp.arange(N_GRAPHS)[:, None]).astype(jnp.float32)
    return adj, bo


def build_block_diag(adj_blocks, num_steps):
    """[B, N, N] per-block adjacency -> [S, M, M] block-diagonal (M = B/S * N)."""
    b, n, _ = adj_blocks.shape
    bps = b // num_steps
    a = adj_blocks.reshape(num_steps, bps, n, n)
    eye = jnp.eye(bps, dtype=adj_blocks.dtype)
    bd = jnp.einsum("sbij,bc->sbicj", a, eye)
    return bd.reshape(num_steps, bps * n, bps * n)


def reference_block(x, adj, bo, p):
    # Pure-jnp reference for one block of the same dense math.
    xw = x @ p["w_gat"]
    mask = (adj > 0) | (jnp.eye(N_NODES) > 0)
    outs = []
    for hd in range(N_HEADS):
        xh = xw[:, hd * HEAD_OUT:(hd + 1) * HEAD_OUT]
        a_s = xh @ p["att_src"][hd]
        a_d = xh @ p["att_dst"][hd]
        e = a_d[:, None] + a_s[None, :]
        e = jnp.where(e > 0, e, NEG_SLOPE * e)
        e = jnp.where(mask, e, NEG_INF)
        e = e - jnp.max(e, axis=1, keepdims=True)
        pp = jnp.where(mask, jnp.exp(e), 0.0)
        alpha = pp / jnp.sum(pp, axis=1, keepdims=True)
        outs.append(alpha @ xh)
    h = jnp.concatenate(outs, axis=-1) + p["b_gat"]
    neigh = adj @ h
    s = (neigh @ p["w_rel"].T + h @ p["w_root"].T + p["b_rel"])[:, 0]
    gm = bo > 0
    s_g = jnp.where(gm, s[None, :], NEG_INF)
    s_g = s_g - jnp.max(s_g, axis=1, keepdims=True)
    pg = jnp.where(gm, jnp.exp(s_g), 0.0)
    score = pg / jnp.sum(pg, axis=1, keepdims=True)
    return h, score @ h


if __name__ == "__main__":
    key = jax.random.PRNGKey(0)
    kx, kp = jax.random.split(key)
    x = jax.random.normal(kx, (B_BLOCKS, N_NODES, IN_FEATS), jnp.float32)
    adj1, bo1 = build_graph()
    adj = jnp.broadcast_to(adj1, (B_BLOCKS, N_NODES, N_NODES))
    bo = jnp.broadcast_to(bo1, (B_BLOCKS, N_GRAPHS, N_NODES))
    params = init_params(kp)
    pslab = pack_params(params)

    num_steps = _default_num_steps()          # 2 on v7x-like chips, else 1
    m_step = TOTAL_NODES // num_steps
    run = make_ssi_ddi_block(num_steps)

    # Data prep (once, outside the hot path): collapse the batch into the node
    # axis and densify the adjacency into per-step block-diagonal form.
    x_steps = x.reshape(num_steps, m_step, IN_FEATS)
    adj_bd = build_block_diag(adj, num_steps)

    h_t, emb = run(x_steps, adj_bd, pslab)
    jax.block_until_ready((h_t, emb))

    # Reference check (test-only layout plumbing).
    h_ref, emb_ref = jax.vmap(
        lambda xb, ab, bb: reference_block(xb, ab, bb, params))(x, adj, bo)
    h_k = jnp.transpose(h_t, (0, 2, 1)).reshape(B_BLOCKS, N_NODES, HID)
    emb_k = emb.reshape(B_BLOCKS, N_GRAPHS, HID)
    # tolerance accounts for the approx EUP reciprocal in the two softmaxes
    assert jnp.allclose(h_k, h_ref, atol=5e-3, rtol=5e-3), \
        float(jnp.max(jnp.abs(h_k - h_ref)))
    assert jnp.allclose(emb_k, emb_ref, atol=5e-3, rtol=5e-3), \
        float(jnp.max(jnp.abs(emb_k - emb_ref)))
    print("KERNEL_OK")
</pallas_src>

<mosaic_0001>
module attributes {stable_mosaic.version = 11 : i64} {
  func.func @ssi_ddi_kernel(%arg0: i32, %arg1: memref<1x128x8xf32, #tpu.memory_space<vmem>>, %arg2: memref<1x128x128xf32, #tpu.memory_space<vmem>>, %arg3: memref<16x128xf32, #tpu.memory_space<vmem>>, %arg4: memref<1x16x128xf32, #tpu.memory_space<vmem>>, %arg5: memref<1x16x16xf32, #tpu.memory_space<vmem>>) attributes {dimension_semantics = [#tpu.dimension_semantics<parallel>], iteration_bounds = array<i64: 1>, scalar_prefetch = 0 : i64, scratch_operands = 0 : i64, tpu.core_type = #tpu.core_type<tc>, window_params = [{transform_indices = @transform_0, window_bounds = array<i64: 1, 128, 8>}, {transform_indices = @transform_1, window_bounds = array<i64: 1, 128, 128>}, {pipeline_mode = #tpu.pipeline_mode<synchronous>, transform_indices = @transform_2, window_bounds = array<i64: 16, 128>}, {transform_indices = @transform_3, window_bounds = array<i64: 1, 16, 128>}, {transform_indices = @transform_4, window_bounds = array<i64: 1, 16, 16>}]} {
    %c0 = arith.constant 0 : index
    %c0_0 = arith.constant 0 : index
    %c0_1 = arith.constant 0 : index
    %0 = vector.load %arg1[%c0, %c0_0, %c0_1] : memref<1x128x8xf32, #tpu.memory_space<vmem>>, vector<1x128x8xf32>
    %1 = vector.shape_cast %0 : vector<1x128x8xf32> to vector<128x8xf32>
    %c0_2 = arith.constant 0 : index
    %c0_3 = arith.constant 0 : index
    %c0_4 = arith.constant 0 : index
    %2 = vector.load %arg2[%c0_2, %c0_3, %c0_4] : memref<1x128x128xf32, #tpu.memory_space<vmem>>, vector<1x128x128xf32>
    %3 = vector.shape_cast %2 : vector<1x128x128xf32> to vector<128x128xf32>
    %c0_5 = arith.constant 0 : index
    %c0_6 = arith.constant 0 : index
    %4 = vector.load %arg3[%c0_5, %c0_6] : memref<16x128xf32, #tpu.memory_space<vmem>>, vector<16x128xf32>
    %5 = vector.extract_strided_slice %4 {offsets = [0, 0], sizes = [8, 128], strides = [1, 1]} : vector<16x128xf32> to vector<8x128xf32>
    %6 = vector.extract_strided_slice %4 {offsets = [8, 0], sizes = [2, 128], strides = [1, 1]} : vector<16x128xf32> to vector<2x128xf32>
    %7 = vector.extract_strided_slice %4 {offsets = [10, 0], sizes = [1, 128], strides = [1, 1]} : vector<16x128xf32> to vector<1x128xf32>
    %8 = vector.extract_strided_slice %4 {offsets = [11, 0], sizes = [1, 128], strides = [1, 1]} : vector<16x128xf32> to vector<1x128xf32>
    %9 = vector.extract_strided_slice %4 {offsets = [12, 0], sizes = [2, 128], strides = [1, 1]} : vector<16x128xf32> to vector<2x128xf32>
    %10 = vector.extract_strided_slice %4 {offsets = [14, 0], sizes = [1, 1], strides = [1, 1]} : vector<16x128xf32> to vector<1x1xf32>
    %11 = tpu.iota {dimensions = array<i32: 0>} : vector<128x128xi32>
    %12 = tpu.iota {dimensions = array<i32: 1>} : vector<128x128xi32>
    %cst = arith.constant 0.000000e+00 : f32
    %13 = vector.broadcast %cst : f32 to vector<128x128xf32>
    %14 = arith.cmpf ogt, %3, %13 : vector<128x128xf32>
    %15 = arith.cmpi eq, %11, %12 : vector<128x128xi32>
    %16 = arith.ori %14, %15 : vector<128x128xi1>
    %cst_7 = arith.constant dense<0.000000e+00> : vector<128x128xf32>
    %17 = tpu.matmul %1, %5, %cst_7 {dimension_numbers = #tpu.dot_dimension_numbers<[1], [0], [0], [1], [0, 0, 1, 1], [], []>} : vector<128x8xf32>, vector<8x128xf32>, vector<128x128xf32> -> vector<128x128xf32>
    %cst_8 = arith.constant dense<0.000000e+00> : vector<2x128xf32>
    %18 = tpu.matmul %6, %17, %cst_8 {dimension_numbers = #tpu.dot_dimension_numbers<[1], [1], [0], [0], [0, 0, 1, 0], [], []>} : vector<2x128xf32>, vector<128x128xf32>, vector<2x128xf32> -> vector<2x128xf32>
    %19 = vector.broadcast %7 : vector<1x128xf32> to vector<128x128xf32>
    %20 = arith.mulf %17, %19 : vector<128x128xf32>
    %21 = tpu.iota {dimensions = array<i32: 1>} : vector<128x128xi32>
    %c0_i32 = arith.constant 0 : i32
    %22 = vector.broadcast %c0_i32 : i32 to vector<128x128xi32>
    %23 = arith.cmpi sge, %21, %22 : vector<128x128xi32>
    %c8_i32 = arith.constant 8 : i32
    %24 = vector.broadcast %c8_i32 : i32 to vector<128x128xi32>
    %25 = arith.cmpi slt, %21, %24 : vector<128x128xi32>
    %26 = arith.andi %23, %25 : vector<128x128xi1>
    %c8_i32_9 = arith.constant 8 : i32
    %27 = vector.broadcast %c8_i32_9 : i32 to vector<128x128xi32>
    %28 = arith.cmpi sge, %21, %27 : vector<128x128xi32>
    %c16_i32 = arith.constant 16 : i32
    %29 = vector.broadcast %c16_i32 : i32 to vector<128x128xi32>
    %30 = arith.cmpi slt, %21, %29 : vector<128x128xi32>
    %31 = arith.andi %28, %30 : vector<128x128xi1>
    %cst_10 = arith.constant 0.000000e+00 : f32
    %32 = vector.broadcast %cst_10 : f32 to vector<128x128xf32>
    %cst_11 = arith.constant 0.000000e+00 : f32
    %33 = vector.broadcast %cst_11 : f32 to vector<128x128xf32>
    %34 = arith.select %26, %20, %33 : vector<128x128xi1>, vector<128x128xf32>
    %cst_12 = arith.constant dense<0.000000e+00> : vector<128xf32>
    %35 = vector.multi_reduction <add>, %34, %cst_12 [1] : vector<128x128xf32> to vector<128xf32>
    %36 = vector.shape_cast %35 : vector<128xf32> to vector<128x1xf32>
    %37 = vector.extract_strided_slice %18 {offsets = [0, 0], sizes = [1, 128], strides = [1, 1]} : vector<2x128xf32> to vector<1x128xf32>
    %38 = vector.broadcast %36 : vector<128x1xf32> to vector<128x128xf32>
    %39 = vector.broadcast %37 : vector<1x128xf32> to vector<128x128xf32>
    %40 = arith.addf %38, %39 : vector<128x128xf32>
    %cst_13 = arith.constant 0.000000e+00 : f32
    %41 = vector.broadcast %cst_13 : f32 to vector<128x128xf32>
    %42 = arith.cmpf ogt, %40, %41 : vector<128x128xf32>
    %cst_14 = arith.constant 2.000000e-01 : f32
    %43 = vector.broadcast %cst_14 : f32 to vector<128x128xf32>
    %44 = arith.mulf %43, %40 : vector<128x128xf32>
    %45 = arith.select %42, %40, %44 : vector<128x128xi1>, vector<128x128xf32>
    %cst_15 = arith.constant -1.000000e+30 : f32
    %46 = vector.broadcast %cst_15 : f32 to vector<128x128xf32>
    %47 = arith.select %16, %45, %46 : vector<128x128xi1>, vector<128x128xf32>
    %cst_16 = arith.constant dense<0xFF800000> : vector<128xf32>
    %48 = vector.multi_reduction <maximumf>, %47, %cst_16 [1] : vector<128x128xf32> to vector<128xf32>
    %49 = vector.shape_cast %48 : vector<128xf32> to vector<128x1xf32>
    %50 = vector.broadcast %49 : vector<128x1xf32> to vector<128x128xf32>
    %51 = arith.subf %47, %50 : vector<128x128xf32>
    %52 = math.exp %51 : vector<128x128xf32>
    %cst_17 = arith.constant dense<0.000000e+00> : vector<128xf32>
    %53 = vector.multi_reduction <add>, %52, %cst_17 [1] : vector<128x128xf32> to vector<128xf32>
    %54 = vector.shape_cast %53 : vector<128xf32> to vector<128x1xf32>
    %55 = tpu.reciprocal %54 {approx = true} : vector<128x1xf32> -> vector<128x1xf32>
    %56 = vector.broadcast %55 : vector<128x1xf32> to vector<128x128xf32>
    %57 = arith.mulf %52, %56 : vector<128x128xf32>
    %cst_18 = arith.constant dense<0.000000e+00> : vector<128x128xf32>
    %58 = tpu.matmul %57, %17, %cst_18 {dimension_numbers = #tpu.dot_dimension_numbers<[1], [0], [0], [1], [0, 0, 1, 1], [], []>} : vector<128x128xf32>, vector<128x128xf32>, vector<128x128xf32> -> vector<128x128xf32>
    %59 = arith.select %26, %58, %32 : vector<128x128xi1>, vector<128x128xf32>
    %cst_19 = arith.constant 0.000000e+00 : f32
    %60 = vector.broadcast %cst_19 : f32 to vector<128x128xf32>
    %61 = arith.select %31, %20, %60 : vector<128x128xi1>, vector<128x128xf32>
    %cst_20 = arith.constant dense<0.000000e+00> : vector<128xf32>
    %62 = vector.multi_reduction <add>, %61, %cst_20 [1] : vector<128x128xf32> to vector<128xf32>
    %63 = vector.shape_cast %62 : vector<128xf32> to vector<128x1xf32>
    %64 = vector.extract_strided_slice %18 {offsets = [1, 0], sizes = [1, 128], strides = [1, 1]} : vector<2x128xf32> to vector<1x128xf32>
    %65 = vector.broadcast %63 : vector<128x1xf32> to vector<128x128xf32>
    %66 = vector.broadcast %64 : vector<1x128xf32> to vector<128x128xf32>
    %67 = arith.addf %65, %66 : vector<128x128xf32>
    %cst_21 = arith.constant 0.000000e+00 : f32
    %68 = vector.broadcast %cst_21 : f32 to vector<128x128xf32>
    %69 = arith.cmpf ogt, %67, %68 : vector<128x128xf32>
    %cst_22 = arith.constant 2.000000e-01 : f32
    %70 = vector.broadcast %cst_22 : f32 to vector<128x128xf32>
    %71 = arith.mulf %70, %67 : vector<128x128xf32>
    %72 = arith.select %69, %67, %71 : vector<128x128xi1>, vector<128x128xf32>
    %cst_23 = arith.constant -1.000000e+30 : f32
    %73 = vector.broadcast %cst_23 : f32 to vector<128x128xf32>
    %74 = arith.select %16, %72, %73 : vector<128x128xi1>, vector<128x128xf32>
    %cst_24 = arith.constant dense<0xFF800000> : vector<128xf32>
    %75 = vector.multi_reduction <maximumf>, %74, %cst_24 [1] : vector<128x128xf32> to vector<128xf32>
    %76 = vector.shape_cast %75 : vector<128xf32> to vector<128x1xf32>
    %77 = vector.broadcast %76 : vector<128x1xf32> to vector<128x128xf32>
    %78 = arith.subf %74, %77 : vector<128x128xf32>
    %79 = math.exp %78 : vector<128x128xf32>
    %cst_25 = arith.constant dense<0.000000e+00> : vector<128xf32>
    %80 = vector.multi_reduction <add>, %79, %cst_25 [1] : vector<128x128xf32> to vector<128xf32>
    %81 = vector.shape_cast %80 : vector<128xf32> to vector<128x1xf32>
    %82 = tpu.reciprocal %81 {approx = true} : vector<128x1xf32> -> vector<128x1xf32>
    %83 = vector.broadcast %82 : vector<128x1xf32> to vector<128x128xf32>
    %84 = arith.mulf %79, %83 : vector<128x128xf32>
    %cst_26 = arith.constant dense<0.000000e+00> : vector<128x128xf32>
    %85 = tpu.matmul %84, %17, %cst_26 {dimension_numbers = #tpu.dot_dimension_numbers<[1], [0], [0], [1], [0, 0, 1, 1], [], []>} : vector<128x128xf32>, vector<128x128xf32>, vector<128x128xf32> -> vector<128x128xf32>
    %86 = arith.select %31, %85, %59 : vector<128x128xi1>, vector<128x128xf32>
    %87 = vector.broadcast %8 : vector<1x128xf32> to vector<128x128xf32>
    %88 = arith.addf %86, %87 : vector<128x128xf32>
    %89 = tpu.iota {dimensions = array<i32: 0>} : vector<16x128xi32>
    %90 = tpu.iota {dimensions = array<i32: 1>} : vector<16x128xi32>
    %91 = arith.cmpi eq, %89, %90 : vector<16x128xi32>
    %92 = arith.extui %91 : vector<16x128xi1> to vector<16x128xi32>
    %93 = arith.sitofp %92 : vector<16x128xi32> to vector<16x128xf32>
    %cst_27 = arith.constant dense<0.000000e+00> : vector<16x128xf32>
    %94 = tpu.matmul %93, %88, %cst_27 {dimension_numbers = #tpu.dot_dimension_numbers<[1], [1], [0], [0], [0, 0, 1, 0], [], []>} : vector<16x128xf32>, vector<128x128xf32>, vector<16x128xf32> -> vector<16x128xf32>
    %c0_28 = arith.constant 0 : index
    %c0_29 = arith.constant 0 : index
    %c0_30 = arith.constant 0 : index
    %95 = vector.load %arg4[%c0_28, %c0_29, %c0_30] : memref<1x16x128xf32, #tpu.memory_space<vmem>>, vector<1x16x128xf32>
    %96 = vector.shape_cast %95 : vector<1x16x128xf32> to vector<16x128xf32>
    %97 = vector.shape_cast %94 : vector<16x128xf32> to vector<1x16x128xf32>
    tpu.vector_store %arg4[%c0_28, %c0_29, %c0_30], %97 {strides = array<i32>} : memref<1x16x128xf32, #tpu.memory_space<vmem>>, vector<1x16x128xf32>,
    %cst_31 = arith.constant dense<0.000000e+00> : vector<2x128xf32>
    %98 = tpu.matmul %9, %88, %cst_31 {dimension_numbers = #tpu.dot_dimension_numbers<[1], [1], [0], [0], [0, 0, 1, 0], [], []>} : vector<2x128xf32>, vector<128x128xf32>, vector<2x128xf32> -> vector<2x128xf32>
    %99 = vector.extract_strided_slice %98 {offsets = [0, 0], sizes = [1, 128], strides = [1, 1]} : vector<2x128xf32> to vector<1x128xf32>
    %cst_32 = arith.constant dense<0.000000e+00> : vector<1x128xf32>
    %100 = tpu.matmul %99, %3, %cst_32 {dimension_numbers = #tpu.dot_dimension_numbers<[1], [1], [0], [0], [0, 0, 1, 0], [], []>} : vector<1x128xf32>, vector<128x128xf32>, vector<1x128xf32> -> vector<1x128xf32>
    %101 = vector.extract_strided_slice %98 {offsets = [1, 0], sizes = [1, 128], strides = [1, 1]} : vector<2x128xf32> to vector<1x128xf32>
    %102 = arith.addf %100, %101 : vector<1x128xf32>
    %103 = vector.broadcast %10 : vector<1x1xf32> to vector<1x128xf32>
    %104 = arith.addf %102, %103 : vector<1x128xf32>
    %105 = tpu.iota {dimensions = array<i32: 0>} : vector<16x128xi32>
    %106 = tpu.iota {dimensions = array<i32: 1>} : vector<16x128xi32>
    %c8_i32_33 = arith.constant 8 : i32
    %107 = vector.broadcast %c8_i32_33 : i32 to vector<16x128xi32>
    %108 = arith.muli %105, %107 : vector<16x128xi32>
    %109 = arith.cmpi sge, %106, %108 : vector<16x128xi32>
    %c8_i32_34 = arith.constant 8 : i32
    %110 = vector.broadcast %c8_i32_34 : i32 to vector<16x128xi32>
    %111 = arith.addi %108, %110 : vector<16x128xi32>
    %112 = arith.cmpi slt, %106, %111 : vector<16x128xi32>
    %113 = arith.andi %109, %112 : vector<16x128xi1>
    %cst_35 = arith.constant -1.000000e+30 : f32
    %114 = vector.shape_cast %104 : vector<1x128xf32> to vector<1x128xf32>
    %115 = vector.broadcast %114 : vector<1x128xf32> to vector<16x128xf32>
    %116 = vector.broadcast %cst_35 : f32 to vector<16x128xf32>
    %117 = arith.select %113, %115, %116 : vector<16x128xi1>, vector<16x128xf32>
    %cst_36 = arith.constant dense<0xFF800000> : vector<16xf32>
    %118 = vector.multi_reduction <maximumf>, %117, %cst_36 [1] : vector<16x128xf32> to vector<16xf32>
    %119 = vector.shape_cast %118 : vector<16xf32> to vector<16x1xf32>
    %120 = vector.broadcast %119 : vector<16x1xf32> to vector<16x128xf32>
    %121 = arith.subf %117, %120 : vector<16x128xf32>
    %122 = math.exp %121 : vector<16x128xf32>
    %cst_37 = arith.constant dense<0.000000e+00> : vector<16xf32>
    %123 = vector.multi_reduction <add>, %122, %cst_37 [1] : vector<16x128xf32> to vector<16xf32>
    %124 = vector.shape_cast %123 : vector<16xf32> to vector<16x1xf32>
    %125 = tpu.reciprocal %124 {approx = true} : vector<16x1xf32> -> vector<16x1xf32>
    %126 = vector.broadcast %125 : vector<16x1xf32> to vector<16x128xf32>
    %127 = arith.mulf %122, %126 : vector<16x128xf32>
    %cst_38 = arith.constant dense<0.000000e+00> : vector<16x16xf32>
    %128 = tpu.matmul %127, %94, %cst_38 {dimension_numbers = #tpu.dot_dimension_numbers<[1], [1], [0], [0], [0, 0, 1, 0], [], []>} : vector<16x128xf32>, vector<16x128xf32>, vector<16x16xf32> -> vector<16x16xf32>
    %c0_39 = arith.constant 0 : index
    %c0_40 = arith.constant 0 : index
    %c0_41 = arith.constant 0 : index
    %129 = vector.load %arg5[%c0_39, %c0_40, %c0_41] : memref<1x16x16xf32, #tpu.memory_space<vmem>>, vector<1x16x16xf32>
    %130 = vector.shape_cast %129 : vector<1x16x16xf32> to vector<16x16xf32>
    %131 = vector.shape_cast %128 : vector<16x16xf32> to vector<1x16x16xf32>
    tpu.vector_store %arg5[%c0_39, %c0_40, %c0_41], %131 {strides = array<i32>} : memref<1x16x16xf32, #tpu.memory_space<vmem>>, vector<1x16x16xf32>,
    return
  }
  func.func @transform_0(%arg0: i32) -> (i32, i32, i32) {
    %c0_i32 = arith.constant 0 : i32
    %c0_i32_0 = arith.constant 0 : i32
    %c0_i32_1 = arith.constant 0 : i32
    return %arg0, %c0_i32, %c0_i32_0 : i32, i32, i32
  }
  func.func @transform_1(%arg0: i32) -> (i32, i32, i32) {
    %c0_i32 = arith.constant 0 : i32
    %c0_i32_0 = arith.constant 0 : i32
    %c0_i32_1 = arith.constant 0 : i32
    return %arg0, %c0_i32, %c0_i32_0 : i32, i32, i32
  }
  func.func @transform_2(%arg0: i32) -> (i32, i32) {
    %c0_i32 = arith.constant 0 : i32
    %c0_i32_0 = arith.constant 0 : i32
    %c0_i32_1 = arith.constant 0 : i32
    return %c0_i32, %c0_i32_0 : i32, i32
  }
  func.func @transform_3(%arg0: i32) -> (i32, i32, i32) {
    %c0_i32 = arith.constant 0 : i32
    %c0_i32_0 = arith.constant 0 : i32
    %c0_i32_1 = arith.constant 0 : i32
    return %arg0, %c0_i32, %c0_i32_0 : i32, i32, i32
  }
  func.func @transform_4(%arg0: i32) -> (i32, i32, i32) {
    %c0_i32 = arith.constant 0 : i32
    %c0_i32_0 = arith.constant 0 : i32
    %c0_i32_1 = arith.constant 0 : i32
    return %arg0, %c0_i32, %c0_i32_0 : i32, i32, i32
  }
}

</mosaic_0001>

<bundles_post_ra>
// kernel: run.1
= control target key start
LH: loop header
LB: loop body
LE: loop exit
PB: predicated region body
PF: predicated region fallthrough
CT: control target
= control target key end

     0   :  { %10 = vsyncpa [#allocation3], 0  ;;  %s2493_s0 = inlined_call_operand.vmem [shape: f32[1,128,8], index: 0, kind: input, shape index: {}]   ;;  %s2494_s1 = inlined_call_operand.vmem [shape: f32[1,128,128], index: 1, kind: input, shape index: {}]   ;;  %s2495_s2 = inlined_call_operand.hbm [shape: f32[16,128], index: 2, kind: input, shape index: {}]   ;;  %s2496_s3 = inlined_call_operand.hbm [shape: f32[1,16,128], index: 3, kind: output, shape index: {0}]   ;;  %s2497_s4 = inlined_call_operand.hbm [shape: f32[1,16,16], index: 4, kind: output, shape index: {1}]  }
   0x1   :  { %11 = vsyncpa [#allocation4], 0 }
   0x2   :  { %12 = vsyncpa [#allocation7], 0  ;;  %s21_s17 = sshll.u32 %s2495_s2, 4  ;;  %s1435_s18 = smov [#allocation2]   ;;  %s22_s17 = int_to_ptr.hbm [resolvable:$true] %s21_s17 }
   0x3   :  { %s23_s19 = sshll.u32 %s1435_s18, 4  ;;  %s1436_s20 = smov 128   ;;  %s24_s19 = int_to_ptr.vmem [resolvable:$true] %s23_s19 }
   0x4   :  { %s1437_s21 = smov 8  }
   0x5   :  { %29 = dma.hbm_to_vmem [thread:$0]  %s22_s17, 256, %s24_s19, [#allocation3], %s1436_s20, %s1436_s20, %s1437_s21  }
   0x6   :  { %1429 = dma.done.wait [#allocation3], 256  }
   0x7   :  { %1430 = vsyncadd [#allocation3], 4294967040  ;;  %vm135_vm0 = vcmask 64512   ;;  %v66_v0 = vld [vmem:[#allocation2] sm:$0xff]  ;;  %v35_v2 = vld [vmem:[%s2493_s0 + $0x8] sm:$0xff]  ;;  %v68_v17 = vlaneseq  ;;  %s1161_s8 = sshll.u32 %s2496_s3, 4  ;;  %s1162_s8 = int_to_ptr.hbm [resolvable:$true] %s1161_s8 }
   0x8   :  { %v34_v1 = vld [vmem:[%s2493_s0] sm:$0xff]  ;;  %199 = vmatpush.msra.mxu0 %v66_v0  ;;  %v36_v3 = vld [vmem:[%s2493_s0 + $0x10] sm:$0xff]  ;;  %v37_v4 = vld [vmem:[%s2493_s0 + $0x18] sm:$0xff]  ;;  %s1440_s9 = smov [#allocation5]   ;;  %s1441_s11 = smov [#allocation6]  }
   0x9   :  { %1192 = vmatmul.msk.f32.vlgmr.msra.gmra.mxu0 %vm135_vm0, %v34_v1  ;;  %v38_v5 = vld [vmem:[%s2493_s0 + $0x20] sm:$0xff]  ;;  %v39_v6 = vld [vmem:[%s2493_s0 + $0x28] sm:$0xff]  ;;  %v40_v7 = vld [vmem:[%s2493_s0 + $0x30] sm:$0xff]  ;;  %v1540_v19 = vand.u32 127, %v68_v17  ;;  %s1159_s10 = sshll.u32 %s1440_s9, 4  ;;  %s1172_s12 = sshll.u32 %s1441_s11, 4  ;;  %s1160_s10 = int_to_ptr.vmem [resolvable:$true] %s1159_s10  ;;  %s1173_s12 = int_to_ptr.vmem [resolvable:$true] %s1172_s12 }
   0xa   :  { %v41_v8 = vld [vmem:[%s2493_s0 + $0x38] sm:$0xff]  ;;  %v42_v9 = vld [vmem:[%s2493_s0 + $0x40] sm:$0xff]  ;;  %v43_v10 = vld [vmem:[%s2493_s0 + $0x48] sm:$0xff]  ;;  %s1174_s15 = sshll.u32 %s2497_s4, 4  ;;  %s1175_s15 = int_to_ptr.hbm [resolvable:$true] %s1174_s15 }
   0xb   :  { %v44_v11 = vld [vmem:[%s2493_s0 + $0x50] sm:$0xff]  ;;  %v45_v12 = vld [vmem:[%s2493_s0 + $0x58] sm:$0xff]  ;;  %v46_v13 = vld [vmem:[%s2493_s0 + $0x60] sm:$0xff]  ;;  %vm2500_vm1 = vcmp.lt.s32.totalorder %v1540_v19, 8  ;;  %vm289_vm2 = vcmp.ge.s32.totalorder %v1540_v19, 8  ;;  %vm290_vm3 = vcmp.lt.s32.totalorder %v1540_v19, 16 }
   0xc   :  { %v47_v14 = vld [vmem:[%s2493_s0 + $0x68] sm:$0xff]  ;;  %v48_v15 = vld [vmem:[%s2493_s0 + $0x70] sm:$0xff]  ;;  %v49_v16 = vld [vmem:[%s2493_s0 + $0x78] sm:$0xff] }
   0xd   :  { %v1536_v18 = vld [vmem:[#allocation2 + $0x8] sm:$0xff]  ;;  %vm1556_vm4 = vmand %vm289_vm2, %vm290_vm3 }
   0xe   :  { %v1543_v20 = vperm.slane %v1536_v18, 2 }
  0x11   :  { %1193 = vmatmul.msk.f32.gmra.mxu0 %vm135_vm0, %v35_v2 }
  0x19   :  { %1194 = vmatmul.msk.f32.gmra.mxu0 %vm135_vm0, %v36_v3 }
  0x21   :  { %1195 = vmatmul.msk.f32.gmra.mxu0 %vm135_vm0, %v37_v4 }
  0x29   :  { %1196 = vmatmul.msk.f32.gmra.mxu0 %vm135_vm0, %v38_v5 }
  0x31   :  { %1197 = vmatmul.msk.f32.gmra.mxu0 %vm135_vm0, %v39_v6 }
  0x39   :  { %1198 = vmatmul.msk.f32.gmra.mxu0 %vm135_vm0, %v40_v7 }
  0x41   :  { %1199 = vmatmul.msk.f32.gmra.mxu0 %vm135_vm0, %v41_v8 }
  0x49   :  { %1200 = vmatmul.msk.f32.gmra.mxu0 %vm135_vm0, %v42_v9 }
  0x51   :  { %1201 = vmatmul.msk.f32.gmra.mxu0 %vm135_vm0, %v43_v10 }
  0x59   :  { %1202 = vmatmul.msk.f32.gmra.mxu0 %vm135_vm0, %v44_v11 }
  0x61   :  { %1203 = vmatmul.msk.f32.gmra.mxu0 %vm135_vm0, %v45_v12 }
  0x69   :  { %1204 = vmatmul.msk.f32.gmra.mxu0 %vm135_vm0, %v46_v13 }
  0x71   :  { %1205 = vmatmul.msk.f32.gmra.mxu0 %vm135_vm0, %v47_v14 }
  0x79   :  { %1206 = vmatmul.msk.f32.gmra.mxu0 %vm135_vm0, %v48_v15 }
  0x81   :  { %1207 = vmatmul.msk.f32.gmra.mxu0 %vm135_vm0, %v49_v16 }
  0x86   :  { %v1545_v21 = vpop.f32.mrf.mxu0 }
  0x87   :  { %v270_v22 = vmul.f32 %v1543_v20, %v1545_v21 }
  0x89   :  { %v292_v23 = vsel %vm2500_vm1, %v270_v22, 0.0  ;;  %v646_v27 = vsel %vm1556_vm4, %v270_v22, 0.0 }
  0x8a   :  { %308 = vadd.xlane.f32.xlu0 %v292_v23 }
  0x8e   :  { %v1554_v24 = vpop.f32.mrf.mxu0 }
  0x8f   :  { %v271_v26 = vmul.f32 %v1543_v20, %v1554_v24 }
  0x91   :  { %v293_v28 = vsel %vm2500_vm1, %v271_v26, 0.0  ;;  %v647_v31 = vsel %vm1556_vm4, %v271_v26, 0.0 }
  0x92   :  { %662 = vadd.xlane.f32.xlu0 %v646_v27  ;;  %310 = vadd.xlane.f32.xlu1 %v293_v28 }
  0x96   :  { %v1566_v29 = vpop.f32.mrf.mxu0 }
  0x97   :  { %v272_v30 = vmul.f32 %v1543_v20, %v1566_v29 }
  0x99   :  { %v294_v32 = vsel %vm2500_vm1, %v272_v30, 0.0  ;;  %v648_v35 = vsel %vm1556_vm4, %v272_v30, 0.0 }
  0x9a   :  { %664 = vadd.xlane.f32.xlu1 %v647_v31  ;;  %312 = vadd.xlane.f32.xlu2 %v294_v32 }
  0x9e   :  { %v1574_v33 = vpop.f32.mrf.mxu0 }
  0x9f   :  { %v273_v34 = vmul.f32 %v1543_v20, %v1574_v33 }
  0xa1   :  { %v649_v36 = vsel %vm1556_vm4, %v273_v34, 0.0  ;;  %v295_v37 = vsel %vm2500_vm1, %v273_v34, 0.0 }
  0xa2   :  { %666 = vadd.xlane.f32.xlu2 %v648_v35  ;;  %668 = vadd.xlane.f32.xlu1 %v649_v36  ;;  %v1713_v36 = vld [vmem:[%s2494_s1 + $0x8] sm:$0xff] }
  0xa3   :  { %314 = vadd.xlane.f32.xlu0 %v295_v37  ;;  %vm88_vm5 = vcmp.gt.f32.partialorder %v1713_v36, 0.0 }
  0xa6   :  { %v1584_v38 = vpop.f32.mrf.mxu0 }
  0xa7   :  { %v274_v39 = vmul.f32 %v1543_v20, %v1584_v38 }
  0xa9   :  { %v650_v40 = vsel %vm1556_vm4, %v274_v39, 0.0  ;;  %v296_v41 = vsel %vm2500_vm1, %v274_v39, 0.0 }
  0xaa   :  { %316 = vadd.xlane.f32.xlu2 %v296_v41 }
  0xab   :  { %670 = vadd.xlane.f32.xlu0 %v650_v40 }
  0xae   :  { %v1592_v42 = vpop.f32.mrf.mxu0 }
  0xaf   :  { %v275_v43 = vmul.f32 %v1543_v20, %v1592_v42 }
  0xb1   :  { %v651_v44 = vsel %vm1556_vm4, %v275_v43, 0.0  ;;  %v297_v45 = vsel %vm2500_vm1, %v275_v43, 0.0 }
  0xb2   :  { %672 = vadd.xlane.f32.xlu2 %v651_v44  ;;  %318 = vadd.xlane.f32.xlu1 %v297_v45 }
  0xb6   :  { %v1600_v46 = vpop.f32.mrf.mxu0 }
  0xb7   :  { %v276_v47 = vmul.f32 %v1543_v20, %v1600_v46 }
  0xb9   :  { %v652_v48 = vsel %vm1556_vm4, %v276_v47, 0.0  ;;  %v298_v49 = vsel %vm2500_vm1, %v276_v47, 0.0 }
  0xba   :  { %674 = vadd.xlane.f32.xlu0 %v652_v48  ;;  %320 = vadd.xlane.f32.xlu2 %v298_v49 }
  0xbe   :  { %v1608_v50 = vpop.f32.mrf.mxu0 }
  0xbf   :  { %v277_v51 = vmul.f32 %v1543_v20, %v1608_v50 }
  0xc1   :  { %v653_v52 = vsel %vm1556_vm4, %v277_v51, 0.0  ;;  %v299_v53 = vsel %vm2500_vm1, %v277_v51, 0.0 }
  0xc2   :  { %676 = vadd.xlane.f32.xlu1 %v653_v52  ;;  %322 = vadd.xlane.f32.xlu0 %v299_v53  ;;  %v1754_v53 = vld [vmem:[%s2494_s1 + $0x10] sm:$0xff] }
  0xc3   :  { %vm89_vm14 = vcmp.gt.f32.partialorder %v1754_v53, 0.0 }
  0xc6   :  { %v1616_v54 = vpop.f32.mrf.mxu0 }
  0xc7   :  { %v278_v55 = vmul.f32 %v1543_v20, %v1616_v54 }
  0xc9   :  { %v654_v56 = vsel %vm1556_vm4, %v278_v55, 0.0  ;;  %v300_v57 = vsel %vm2500_vm1, %v278_v55, 0.0 }
  0xca   :  { %678 = vadd.xlane.f32.xlu2 %v654_v56  ;;  %324 = vadd.xlane.f32.xlu1 %v300_v57 }
  0xce   :  { %v1624_v58 = vpop.f32.mrf.mxu0 }
  0xcf   :  { %v279_v59 = vmul.f32 %v1543_v20, %v1624_v58 }
  0xd1   :  { %v655_v60 = vsel %vm1556_vm4, %v279_v59, 0.0  ;;  %v301_v61 = vsel %vm2500_vm1, %v279_v59, 0.0 }
  0xd2   :  { %680 = vadd.xlane.f32.xlu0 %v655_v60  ;;  %326 = vadd.xlane.f32.xlu2 %v301_v61 }
  0xd6   :  { %v231_v62 = vpop.f32.mrf.mxu0 }
  0xd7   :  { %v280_v63 = vmul.f32 %v1543_v20, %v231_v62 }
  0xd9   :  { %v656_v0 = vsel %vm1556_vm4, %v280_v63, 0.0  ;;  %v302_v1 = vsel %vm2500_vm1, %v280_v63, 0.0 }
  0xda   :  { %682 = vadd.xlane.f32.xlu1 %v656_v0  ;;  %328 = vadd.xlane.f32.xlu0 %v302_v1  ;;  %v1778_v1 = vld [vmem:[%s2494_s1 + $0x78] sm:$0xff] }
  0xde   :  { %v234_v2 = vpop.f32.mrf.mxu0 }
  0xdf   :  { %v281_v3 = vmul.f32 %v1543_v20, %v234_v2 }
  0xe1   :  { %v657_v4 = vsel %vm1556_vm4, %v281_v3, 0.0  ;;  %v303_v5 = vsel %vm2500_vm1, %v281_v3, 0.0 }
  0xe2   :  { %684 = vadd.xlane.f32.xlu2 %v657_v4  ;;  %330 = vadd.xlane.f32.xlu1 %v303_v5  ;;  %v1901_v5 = vld [vmem:[%s2494_s1 + $0x50] sm:$0xff] }
  0xe6   :  { %v237_v6 = vpop.f32.mrf.mxu0 }
  0xe7   :  { %v282_v7 = vmul.f32 %v1543_v20, %v237_v6 }
  0xe9   :  { %v658_v8 = vsel %vm1556_vm4, %v282_v7, 0.0  ;;  %v304_v9 = vsel %vm2500_vm1, %v282_v7, 0.0 }
  0xea   :  { %686 = vadd.xlane.f32.xlu1 %v658_v8  ;;  %332 = vadd.xlane.f32.xlu2 %v304_v9  ;;  %v1791_v9 = vld [vmem:[%s2494_s1 + $0x70] sm:$0xff] }
  0xee   :  { %v240_v10 = vpop.f32.mrf.mxu0 }
  0xef   :  { %v283_v11 = vmul.f32 %v1543_v20, %v240_v10 }
  0xf1   :  { %v659_v12 = vsel %vm1556_vm4, %v283_v11, 0.0  ;;  %v305_v13 = vsel %vm2500_vm1, %v283_v11, 0.0 }
  0xf2   :  { %688 = vadd.xlane.f32.xlu1 %v659_v12  ;;  %334 = vadd.xlane.f32.xlu2 %v305_v13  ;;  %v1799_v13 = vld [vmem:[%s2494_s1 + $0x20] sm:$0xff] }
  0xf6   :  { %v243_v14 = vpop.f32.mrf.mxu0 }
  0xf7   :  { %v284_v15 = vmul.f32 %v1543_v20, %v243_v14 }
  0xf9   :  { %v660_v16 = vsel %vm1556_vm4, %v284_v15, 0.0  ;;  %v306_v22 = vsel %vm2500_vm1, %v284_v15, 0.0 }
  0xfa   :  { %690 = vadd.xlane.f32.xlu1 %v660_v16  ;;  %336 = vadd.xlane.f32.xlu2 %v306_v22  ;;  %v1813_v22 = vld [vmem:[%s2494_s1 + $0x18] sm:$0xff] }
  0xfd   :  { %v309_v35 = vpop.xlane.xlu0 %308 }
  0xfe   :  { %v246_v23 = vpop.f32.mrf.mxu0 }
  0xff   :  { %249 = vmatpush.xpose.msra.mxu1 %v246_v23  ;;  %565 = vmatpush.msra.mxu2 %v246_v23  ;;  %v1658_v26 = vmul.f32 %v1543_v20, %v246_v23 }
 0x100   :  { %919 = vmatpush.msra.mxu3 %v246_v23 }
 0x101   :  { %566 = vmatpush.msra.mxu2 %v243_v14  ;;  %v307_v27 = vsel %vm2500_vm1, %v1658_v26, 0.0  ;;  %vm101_vm1 = vcmp.gt.f32.partialorder %v1791_v9, 0.0 }
 0x102   :  { %920 = vmatpush.msra.mxu3 %v243_v14  ;;  %338 = vadd.xlane.f32.xlu2 %v307_v27 }
 0x103   :  { %250 = vmatpush.xpose.msra.mxu1 %v243_v14  ;;  %567 = vmatpush.msra.mxu2 %v240_v10 }
 0x104   :  { %921 = vmatpush.msra.mxu3 %v240_v10 }
 0x105   :  { %568 = vmatpush.msra.mxu2 %v237_v6 }
 0x106   :  { %922 = vmatpush.msra.mxu3 %v237_v6 }
 0x107   :  { %251 = vmatpush.xpose.msra.mxu1 %v240_v10  ;;  %569 = vmatpush.msra.mxu2 %v234_v2 }
 0x108   :  { %923 = vmatpush.msra.mxu3 %v234_v2 }
 0x109   :  { %570 = vmatpush.msra.mxu2 %v231_v62 }
 0x10a   :  { %924 = vmatpush.msra.mxu3 %v231_v62 }
 0x10b   :  { %252 = vmatpush.xpose.msra.mxu1 %v237_v6  ;;  %571 = vmatpush.msra.mxu2 %v1624_v58 }
 0x10c   :  { %925 = vmatpush.msra.mxu3 %v1624_v58 }
 0x10d   :  { %572 = vmatpush.msra.mxu2 %v1616_v54  ;;  %v313_v20 = vpop.xlane.xlu2 %312 }
 0x10e   :  { %926 = vmatpush.msra.mxu3 %v1616_v54 }
 0x10f   :  { %253 = vmatpush.xpose.msra.mxu1 %v234_v2  ;;  %573 = vmatpush.msra.mxu2 %v1608_v50 }
 0x110   :  { %927 = vmatpush.msra.mxu3 %v1608_v50 }
 0x111   :  { %574 = vmatpush.msra.mxu2 %v1600_v46 }
 0x112   :  { %928 = vmatpush.msra.mxu3 %v1600_v46 }
 0x113   :  { %254 = vmatpush.xpose.msra.mxu1 %v231_v62  ;;  %575 = vmatpush.msra.mxu2 %v1592_v42 }
 0x114   :  { %929 = vmatpush.msra.mxu3 %v1592_v42 }
 0x115   :  { %576 = vmatpush.msra.mxu2 %v1584_v38  ;;  %v667_v28 = vpop.xlane.xlu2 %666 }
 0x116   :  { %930 = vmatpush.msra.mxu3 %v1584_v38 }
 0x117   :  { %255 = vmatpush.xpose.msra.mxu1 %v1624_v58  ;;  %577 = vmatpush.msra.mxu2 %v1574_v33 }
 0x118   :  { %931 = vmatpush.msra.mxu3 %v1574_v33 }
 0x119   :  { %578 = vmatpush.msra.mxu2 %v1566_v29 }
 0x11a   :  { %932 = vmatpush.msra.mxu3 %v1566_v29 }
 0x11b   :  { %256 = vmatpush.xpose.msra.mxu1 %v1616_v54  ;;  %579 = vmatpush.msra.mxu2 %v1554_v24 }
 0x11c   :  { %933 = vmatpush.msra.mxu3 %v1554_v24 }
 0x11d   :  { %580 = vmatpush.msra.mxu2 %v1545_v21  ;;  %v1694_v30 = vpop.xlane.xlu2 %316 }
 0x11e   :  { %934 = vmatpush.msra.mxu3 %v1545_v21 }
 0x11f   :  { %257 = vmatpush.xpose.msra.mxu1 %v1608_v50  ;;  %1072 = vmatpush.xpose.msrb.mxu2 %v1778_v1 }
 0x123   :  { %258 = vmatpush.xpose.msra.mxu1 %v1600_v46  ;;  %1073 = vmatpush.xpose.msrb.mxu2 %v1791_v9 }
 0x125   :  { %v1696_v31 = vpop.xlane.xlu2 %672 }
 0x127   :  { %259 = vmatpush.xpose.msra.mxu1 %v1592_v42 }
 0x12b   :  { %260 = vmatpush.xpose.msra.mxu1 %v1584_v38  ;;  %v1720_v38 = vld [vmem:[%s2494_s1] sm:$0xff] }
 0x12c   :  { %vm87_vm7 = vcmp.gt.f32.partialorder %v1720_v38, 0.0 }
 0x12d   :  { %v1698_v32 = vpop.xlane.xlu2 %320 }
 0x12f   :  { %261 = vmatpush.xpose.msra.mxu1 %v1574_v33 }
 0x133   :  { %262 = vmatpush.xpose.msra.mxu1 %v1566_v29  ;;  %v311_v29 = vpop.xlane.xlu1 %310 }
 0x137   :  { %263 = vmatpush.xpose.msra.mxu1 %v1554_v24  ;;  %v1705_v24 = vshrl.u32 %v68_v17, 7 }
 0x139   :  { %vm2499_vm8 = vcmp.eq.s32.totalorder %v1705_v24, %v1540_v19  ;;  %v71_v54 = vadd.s32 16, %v1705_v24  ;;  %v73_v11 = vadd.s32 32, %v1705_v24  ;;  %v72_v14 = vadd.s32 24, %v1705_v24 }
 0x13a   :  { %vm1747_vm11 = vmor %vm87_vm7, %vm2499_vm8  ;;  %vm91_vm7 = vcmp.gt.f32.partialorder %v1799_v13, 0.0  ;;  %v83_v46 = vadd.s32 112, %v1705_v24 }
 0x13b   :  { %264 = vmatpush.xpose.msra.mxu1 %v1545_v21  ;;  %v663_v21 = vpop.xlane.xlu0 %662  ;;  %v665_v41 = vpop.xlane.xlu1 %664  ;;  %vm105_vm15 = vcmp.eq.s32.totalorder %v71_v54, %v1540_v19 }
 0x13d   :  { %v1700_v34 = vpop.xlane.xlu2 %678 }
 0x13e   :  { %265 = vmatmul.f32.vlgmr.msra.gmra.mxu1 %v1536_v18  ;;  %v1708_v18 = vadd.s32 8, %v1705_v24 }
 0x140   :  { %vm2498_vm6 = vcmp.eq.s32.totalorder %v1708_v18, %v1540_v19  ;;  %v1099_v25 = vmul.u32 8, %v1708_v18 }
 0x141   :  { %vm1738_vm9 = vmor %vm88_vm5, %vm2498_vm6 }
 0x142   :  { %vm1783_vm5 = vmor %vm89_vm14, %vm105_vm15 }
 0x143   :  { %v315_v42 = vpop.xlane.xlu0 %314  ;;  %v669_v3 = vpop.xlane.xlu1 %668 }
 0x145   :  { %v1702_v33 = vpop.xlane.xlu2 %326 }
 0x14b   :  { %v671_v4 = vpop.xlane.xlu0 %670 }
 0x155   :  { %v1715_v37 = vpop.xlane.xlu2 %684 }
 0x15d   :  { %v1766_v62 = vpop.xlane.xlu2 %332 }
 0x1bb   :  { %v266_v39 = vpop.f32.mrf.mxu1 }
 0x1bc   :  { %v1722_v40 = vperm.slane %v266_v39, 0  ;;  %v1724_v17 = vperm.slane %v266_v39, 1 }
 0x1be   :  { %v696_v43 = vadd.f32 %v1724_v17, %v665_v41  ;;  %v695_v44 = vadd.f32 %v1724_v17, %v663_v21  ;;  %v341_v45 = vadd.f32 %v1722_v40, %v309_v35  ;;  %v343_v47 = vadd.f32 %v1722_v40, %v313_v20  ;;  %v1824_v20 = vld [vmem:[%s2494_s1 + $0x68] sm:$0xff]  ;;  %v1830_v35 = vpop.xlane.xlu2 %334 }
 0x1bf   :  { %v342_v48 = vadd.f32 %v1722_v40, %v311_v29  ;;  %v697_v55 = vadd.f32 %v1724_v17, %v667_v28  ;;  %v699_v8 = vadd.f32 %v1724_v17, %v671_v4  ;;  %v344_v12 = vadd.f32 %v1722_v40, %v315_v42  ;;  %1074 = vmatpush.xpose.msrb.mxu2 %v1824_v20  ;;  %v319_v29 = vpop.xlane.xlu1 %318  ;;  %v1842_v42 = vld [vmem:[%s2494_s1 + $0x28] sm:$0xff] }
 0x1c0   :  { %vm712_vm10 = vcmp.gt.f32.partialorder %v696_v43, 0.0  ;;  %v728_v49 = vmul.f32 0.2, %v696_v43  ;;  %vm711_vm12 = vcmp.gt.f32.partialorder %v695_v44, 0.0  ;;  %v727_v51 = vmul.f32 0.2, %v695_v44 }
 0x1c1   :  { %vm357_vm13 = vcmp.gt.f32.partialorder %v341_v45, 0.0  ;;  %v373_v52 = vmul.f32 0.2, %v341_v45  ;;  %v375_v61 = vmul.f32 0.2, %v343_v47  ;;  %vm359_vm0 = vcmp.gt.f32.partialorder %v343_v47, 0.0 }
 0x1c2   :  { %v744_v56 = vsel %vm712_vm10, %v696_v43, %v728_v49  ;;  %v743_v57 = vsel %vm711_vm12, %v695_v44, %v727_v51  ;;  %v374_v0 = vmul.f32 0.2, %v342_v48  ;;  %vm358_vm2 = vcmp.gt.f32.partialorder %v342_v48, 0.0  ;;  %v61_v51 = vld [vmem:[%s2494_s1 + $0x58] sm:$0xff] }
 0x1c3   :  { %v1760_v58 = vsel %vm1738_vm9, %v744_v56, -1e+30  ;;  %v1764_v59 = vsel %vm1747_vm11, %v743_v57, -1e+30  ;;  %v389_v60 = vsel %vm357_vm13, %v341_v45, %v373_v52  ;;  %v729_v2 = vmul.f32 0.2, %v697_v55  ;;  %v675_v56 = vpop.xlane.xlu0 %674 }
 0x1c4   :  { %777 = vmax.xlane.f32.xlu2 %v1760_v58  ;;  %775 = vmax.xlane.f32.xlu1 %v1764_v59  ;;  %v1772_v63 = vsel %vm1747_vm11, %v389_v60, -1e+30  ;;  %vm713_vm3 = vcmp.gt.f32.partialorder %v697_v55, 0.0  ;;  %v391_v6 = vsel %vm359_vm0, %v343_v47, %v375_v61  ;;  %v390_v7 = vsel %vm358_vm2, %v342_v48, %v374_v0  ;;  %v1849_v45 = vld [vmem:[%s2494_s1 + $0x60] sm:$0xff]  ;;  %v1884_v61 = vld [vmem:[%s2494_s1 + $0x30] sm:$0xff] }
 0x1c5   :  { %421 = vmax.xlane.f32.xlu0 %v1772_v63  ;;  %v745_v10 = vsel %vm713_vm3, %v697_v55, %v729_v2  ;;  %v1804_v15 = vsel %vm1783_vm5, %v391_v6, -1e+30  ;;  %v1808_v16 = vsel %vm1738_vm9, %v390_v7, -1e+30  ;;  %v731_v27 = vmul.f32 0.2, %v699_v8  ;;  %1075 = vmatpush.xpose.msrb.mxu2 %v1849_v45 }
 0x1c6   :  { %v1819_v23 = vsel %vm1783_vm5, %v745_v10, -1e+30  ;;  %vm107_vm9 = vcmp.eq.s32.totalorder %v73_v11, %v1540_v19  ;;  %vm715_vm10 = vcmp.gt.f32.partialorder %v699_v8, 0.0  ;;  %v376_v28 = vmul.f32 0.2, %v344_v12  ;;  %v337_v2 = vpop.xlane.xlu2 %336 }
 0x1c7   :  { %vm90_vm11 = vcmp.gt.f32.partialorder %v1813_v22, 0.0  ;;  %vm106_vm12 = vcmp.eq.s32.totalorder %v72_v14, %v1540_v19  ;;  %vm360_vm13 = vcmp.gt.f32.partialorder %v344_v12, 0.0  ;;  %v74_v21 = vadd.s32 40, %v1705_v24  ;;  %vm1835_vm14 = vmor %vm91_vm7, %vm107_vm9 }
 0x1c8   :  { %v747_v41 = vsel %vm715_vm10, %v699_v8, %v731_v27  ;;  %v346_v43 = vadd.f32 %v1722_v40, %v319_v29  ;;  %v698_v44 = vadd.f32 %v1724_v17, %v669_v3  ;;  %vm1851_vm15 = vmor %vm90_vm11, %vm106_vm12  ;;  %v392_v47 = vsel %vm360_vm13, %v344_v12, %v376_v28  ;;  %v1930_v28 = vld [vmem:[%s2494_s1 + $0x48] sm:$0xff] }
 0x1c9   :  { %v700_v48 = vadd.f32 %v1724_v17, %v1696_v31  ;;  %v661_v49 = vsel %vm1556_vm4, %v1658_v26, 0.0  ;;  %v1863_v50 = vsel %vm1835_vm14, %v747_v41, -1e+30  ;;  %vm92_vm0 = vcmp.gt.f32.partialorder %v1842_v42, 0.0  ;;  %1076 = vmatpush.xpose.msrb.mxu2 %v61_v51 }
 0x1ca   :  { %vm108_vm2 = vcmp.eq.s32.totalorder %v74_v21, %v1540_v19  ;;  %v80_v31 = vadd.s32 88, %v1705_v24  ;;  %v1874_v26 = vsel %vm1851_vm15, %v392_v47, -1e+30  ;;  %v378_v52 = vmul.f32 0.2, %v346_v43  ;;  %v677_v47 = vpop.xlane.xlu1 %676 }
 0x1cb   :  { %v730_v54 = vmul.f32 0.2, %v698_v44  ;;  %v706_v55 = vadd.f32 %v1724_v17, %v1715_v37  ;;  %vm362_vm3 = vcmp.gt.f32.partialorder %v346_v43, 0.0  ;;  %vm714_vm5 = vcmp.gt.f32.partialorder %v698_v44, 0.0  ;;  %vm1893_vm11 = vmor %vm92_vm0, %vm108_vm2 }
 0x1cc   :  { %425 = vmax.xlane.f32.xlu2 %v1804_v15  ;;  %423 = vmax.xlane.f32.xlu1 %v1808_v16  ;;  %v732_v57 = vmul.f32 0.2, %v700_v48  ;;  %v345_v60 = vadd.f32 %v1722_v40, %v1694_v30  ;;  %vm716_vm7 = vcmp.gt.f32.partialorder %v700_v48, 0.0  ;;  %v75_v0 = vadd.s32 48, %v1705_v24 }
 0x1cd   :  { %779 = vmax.xlane.f32.xlu0 %v1819_v23  ;;  %vm98_vm9 = vcmp.gt.f32.partialorder %v61_v51, 0.0  ;;  %vm114_vm10 = vcmp.eq.s32.totalorder %v80_v31, %v1540_v19  ;;  %v82_v37 = vadd.s32 104, %v1705_v24  ;;  %v394_v3 = vsel %vm362_vm3, %v346_v43, %v378_v52  ;;  %1077 = vmatpush.xpose.msrb.mxu2 %v1901_v5 }
 0x1ce   :  { %v746_v4 = vsel %vm714_vm5, %v698_v44, %v730_v54  ;;  %vm93_vm12 = vcmp.gt.f32.partialorder %v1884_v61, 0.0  ;;  %v81_v6 = vadd.s32 96, %v1705_v24  ;;  %v748_v7 = vsel %vm716_vm7, %v700_v48, %v732_v57  ;;  %vm1940_vm6 = vmor %vm98_vm9, %vm114_vm10  ;;  %v323_v48 = vpop.xlane.xlu0 %322  ;;  %v339_v30 = vpop.xlane.xlu2 %338 }
 0x1cf   :  { %v738_v8 = vmul.f32 0.2, %v706_v55  ;;  %v377_v10 = vmul.f32 0.2, %v345_v60  ;;  %v347_v11 = vadd.f32 %v1722_v40, %v1698_v32  ;;  %vm722_vm13 = vcmp.gt.f32.partialorder %v706_v55, 0.0 }
 0x1d0   :  { %vm361_vm0 = vcmp.gt.f32.partialorder %v345_v60, 0.0  ;;  %vm109_vm2 = vcmp.eq.s32.totalorder %v75_v0, %v1540_v19  ;;  %v1909_v12 = vadd.s32 56, %v1705_v24  ;;  %v1913_v14 = vsel %vm1893_vm11, %v394_v3, -1e+30 }
 0x1d1   :  { %v1917_v27 = vsel %vm1851_vm15, %v746_v4, -1e+30  ;;  %vm100_vm3 = vcmp.gt.f32.partialorder %v1824_v20, 0.0  ;;  %vm116_vm5 = vcmp.eq.s32.totalorder %v82_v37, %v1540_v19  ;;  %v1925_v32 = vsel %vm1893_vm11, %v748_v7, -1e+30  ;;  %1078 = vmatpush.xpose.msrb.mxu2 %v1930_v28  ;;  %v57_v7 = vld [vmem:[%s2494_s1 + $0x38] sm:$0xff] }
 0x1d2   :  { %vm99_vm15 = vcmp.gt.f32.partialorder %v1849_v45, 0.0  ;;  %vm115_vm7 = vcmp.eq.s32.totalorder %v81_v6, %v1540_v19  ;;  %v353_v29 = vadd.f32 %v1722_v40, %v1766_v62  ;;  %v754_v41 = vsel %vm722_vm13, %v706_v55, %v738_v8  ;;  %vm1974_vm13 = vmor %vm93_vm12, %vm109_vm2 }
 0x1d3   :  { %v393_v43 = vsel %vm361_vm0, %v345_v60, %v377_v10  ;;  %v379_v44 = vmul.f32 0.2, %v347_v11  ;;  %vm363_vm11 = vcmp.gt.f32.partialorder %v347_v11, 0.0  ;;  %v701_v62 = vadd.f32 %v1724_v17, %v675_v56  ;;  %vm1954_vm9 = vmor %vm99_vm15, %vm115_vm7 }
 0x1d4   :  { %783 = vmax.xlane.f32.xlu2 %v1863_v50  ;;  %692 = vadd.xlane.f32.xlu1 %v661_v49  ;;  %vm369_vm8 = vcmp.gt.f32.partialorder %v353_v29, 0.0  ;;  %v385_v51 = vmul.f32 0.2, %v353_v29  ;;  %vm117_vm10 = vcmp.eq.s32.totalorder %v83_v46, %v1540_v19  ;;  %v355_v31 = vadd.f32 %v1722_v40, %v337_v2  ;;  %vm1994_vm0 = vmor %vm100_vm3, %vm116_vm5 }
 0x1d5   :  { %427 = vmax.xlane.f32.xlu0 %v1874_v26  ;;  %v354_v52 = vadd.f32 %v1722_v40, %v1830_v35  ;;  %v1964_v54 = vsel %vm1940_vm6, %v754_v41, -1e+30  ;;  %v1968_v55 = vsel %vm1835_vm14, %v393_v43, -1e+30  ;;  %v348_v56 = vadd.f32 %v1722_v40, %v323_v48  ;;  %v58_v35 = vld [vmem:[%s2494_s1 + $0x40] sm:$0xff]  ;;  %vm1986_vm14 = vmor %vm101_vm1, %vm117_vm10  ;;  %v325_v48 = vpop.xlane.xlu1 %324 }
 0x1d6   :  { %v84_v57 = vadd.s32 120, %v1705_v24  ;;  %v395_v39 = vsel %vm363_vm11, %v347_v11, %v379_v44  ;;  %v401_v60 = vsel %vm369_vm8, %v353_v29, %v385_v51  ;;  %vm371_vm12 = vcmp.gt.f32.partialorder %v355_v31, 0.0  ;;  %1079 = vmatpush.xpose.msrb.mxu2 %v58_v35 }
 0x1d7   :  { %v387_v2 = vmul.f32 0.2, %v355_v31  ;;  %v2000_v4 = vsel %vm1954_vm9, %v401_v60, -1e+30  ;;  %vm370_vm1 = vcmp.gt.f32.partialorder %v354_v52, 0.0  ;;  %vm102_vm8 = vcmp.gt.f32.partialorder %v1778_v1, 0.0 }
 0x1d8   :  { %v386_v9 = vmul.f32 0.2, %v354_v52  ;;  %v733_v6 = vmul.f32 0.2, %v701_v62  ;;  %vm118_vm2 = vcmp.eq.s32.totalorder %v84_v57, %v1540_v19  ;;  %v356_v20 = vadd.f32 %v1722_v40, %v339_v30 }
 0x1d9   :  { %v403_v37 = vsel %vm371_vm12, %v355_v31, %v387_v2  ;;  %v2012_v8 = vsel %vm1974_vm13, %v395_v39, -1e+30  ;;  %v380_v10 = vmul.f32 0.2, %v348_v56  ;;  %vm717_vm3 = vcmp.gt.f32.partialorder %v701_v62, 0.0  ;;  %vm2025_vm5 = vmor %vm102_vm8, %vm118_vm2 }
 0x1da   :  { %v2016_v11 = vsel %vm1986_vm14, %v403_v37, -1e+30  ;;  %v402_v29 = vsel %vm370_vm1, %v354_v52, %v386_v9  ;;  %vm372_vm15 = vcmp.gt.f32.partialorder %v356_v20, 0.0  ;;  %v388_v44 = vmul.f32 0.2, %v356_v20  ;;  %1080 = vmatpush.xpose.msrb.mxu2 %v57_v7 }
 0x1db   :  { %v2021_v41 = vsel %vm1994_vm0, %v402_v29, -1e+30  ;;  %vm94_vm7 = vcmp.gt.f32.partialorder %v57_v7, 0.0  ;;  %vm110_vm11 = vcmp.eq.s32.totalorder %v1909_v12, %v1540_v19  ;;  %vm364_vm10 = vcmp.gt.f32.partialorder %v348_v56, 0.0 }
 0x1dc   :  { %431 = vmax.xlane.f32.xlu2 %v1913_v14  ;;  %781 = vmax.xlane.f32.xlu1 %v1917_v27  ;;  %v404_v46 = vsel %vm372_vm15, %v356_v20, %v388_v44  ;;  %v749_v51 = vsel %vm717_vm3, %v701_v62, %v733_v6  ;;  %v702_v31 = vadd.f32 %v1724_v17, %v677_v47  ;;  %vm2036_vm12 = vmor %vm94_vm7, %vm110_vm11  ;;  %v77_v12 = vadd.s32 64, %v1705_v24 }
 0x1dd   :  { %785 = vmax.xlane.f32.xlu0 %v1925_v32  ;;  %v2034_v1 = vsel %vm2025_vm5, %v404_v46, -1e+30  ;;  %v396_v57 = vsel %vm364_vm10, %v348_v56, %v380_v10  ;;  %v349_v39 = vadd.f32 %v1722_v40, %v325_v48  ;;  %v2045_v62 = vsel %vm1974_vm13, %v749_v51, -1e+30  ;;  %v683_v30 = vpop.xlane.xlu1 %682 }
 0x1de   :  { %1081 = vmatpush.xpose.msrb.mxu2 %v1884_v61  ;;  %v2050_v47 = vsel %vm2036_vm12, %v396_v57, -1e+30  ;;  %v734_v60 = vmul.f32 0.2, %v702_v31  ;;  %vm718_vm1 = vcmp.gt.f32.partialorder %v702_v31, 0.0  ;;  %v681_v61 = vpop.xlane.xlu0 %680  ;;  %vm95_vm8 = vcmp.gt.f32.partialorder %v58_v35, 0.0 }
 0x1df   :  { %v381_v56 = vmul.f32 0.2, %v349_v39  ;;  %vm111_vm2 = vcmp.eq.s32.totalorder %v77_v12, %v1540_v19  ;;  %vm365_vm3 = vcmp.gt.f32.partialorder %v349_v39, 0.0  ;;  %v703_v2 = vadd.f32 %v1724_v17, %v1700_v34 }
 0x1e0   :  { %v750_v45 = vsel %vm718_vm1, %v702_v31, %v734_v60  ;;  %vm2057_vm13 = vmor %vm95_vm8, %vm111_vm2  ;;  %v350_v7 = vadd.f32 %v1722_v40, %v1702_v33  ;;  %vm96_vm7 = vcmp.gt.f32.partialorder %v1930_v28, 0.0  ;;  %v704_v10 = vadd.f32 %v1724_v17, %v681_v61 }
 0x1e1   :  { %v397_v6 = vsel %vm365_vm3, %v349_v39, %v381_v56  ;;  %v2067_v35 = vsel %vm2036_vm12, %v750_v45, -1e+30  ;;  %v735_v37 = vmul.f32 0.2, %v703_v2  ;;  %vm719_vm15 = vcmp.gt.f32.partialorder %v703_v2, 0.0 }
 0x1e2   :  { %1082 = vmatpush.xpose.msrb.mxu2 %v1842_v42  ;;  %v78_v42 = vadd.s32 72, %v1705_v24  ;;  %v2072_v34 = vsel %vm2057_vm13, %v397_v6, -1e+30  ;;  %v382_v20 = vmul.f32 0.2, %v350_v7  ;;  %vm366_vm10 = vcmp.gt.f32.partialorder %v350_v7, 0.0 }
 0x1e3   :  { %v736_v31 = vmul.f32 0.2, %v704_v10  ;;  %vm720_vm1 = vcmp.gt.f32.partialorder %v704_v10, 0.0  ;;  %vm97_vm8 = vcmp.gt.f32.partialorder %v1901_v5, 0.0  ;;  %v705_v57 = vadd.f32 %v1724_v17, %v683_v30 }
 0x1e4   :  { %797 = vmax.xlane.f32.xlu2 %v1964_v54  ;;  %429 = vmax.xlane.f32.xlu1 %v1968_v55  ;;  %vm112_vm11 = vcmp.eq.s32.totalorder %v78_v42, %v1540_v19  ;;  %v398_v44 = vsel %vm366_vm10, %v350_v7, %v382_v20 }
 0x1e5   :  { %433 = vmax.xlane.f32.xlu0 %v2012_v8  ;;  %vm2079_vm12 = vmor %vm96_vm7, %vm112_vm11  ;;  %v331_v48 = vpop.xlane.xlu1 %330 }
 0x1e6   :  { %1083 = vmatpush.xpose.msrb.mxu2 %v1799_v13  ;;  %v329_v33 = vpop.xlane.xlu0 %328  ;;  %v751_v13 = vsel %vm719_vm15, %v703_v2, %v735_v37  ;;  %v2093_v51 = vsel %vm2079_vm12, %v398_v44, -1e+30  ;;  %vm721_vm15 = vcmp.gt.f32.partialorder %v705_v57, 0.0  ;;  %v352_v61 = vadd.f32 %v1722_v40, %v331_v48 }
 0x1e7   :  { %v351_v46 = vadd.f32 %v1722_v40, %v329_v33  ;;  %v2088_v28 = vsel %vm2057_vm13, %v751_v13, -1e+30 }
 0x1e8   :  { %vm368_vm7 = vcmp.gt.f32.partialorder %v352_v61, 0.0 }
 0x1e9   :  { %v383_v52 = vmul.f32 0.2, %v351_v46  ;;  %vm367_vm3 = vcmp.gt.f32.partialorder %v351_v46, 0.0 }
 0x1ea   :  { %1084 = vmatpush.xpose.msrb.mxu2 %v1813_v22  ;;  %v79_v22 = vadd.s32 80, %v1705_v24 }
 0x1eb   :  { %v399_v39 = vsel %vm367_vm3, %v351_v46, %v383_v52 }
 0x1ec   :  { %787 = vmax.xlane.f32.xlu1 %v2045_v62  ;;  %vm113_vm2 = vcmp.eq.s32.totalorder %v79_v22, %v1540_v19 }
 0x1ed   :  { %435 = vmax.xlane.f32.xlu0 %v2050_v47  ;;  %vm129_vm13 = vmor %vm97_vm8, %vm113_vm2  ;;  %v2108_v5 = vpop.xlane.xlu1 %686 }
 0x1ee   :  { %1085 = vmatpush.xpose.msrb.mxu2 %v1754_v53  ;;  %v752_v53 = vsel %vm720_vm1, %v704_v10, %v736_v31  ;;  %v2106_v60 = vsel %vm129_vm13, %v399_v39, -1e+30 }
 0x1ef   :  { %v2103_v12 = vsel %vm2079_vm12, %v752_v53, -1e+30 }
 0x1f2   :  { %1086 = vmatpush.xpose.msrb.mxu2 %v1713_v36  ;;  %v737_v36 = vmul.f32 0.2, %v705_v57 }
 0x1f4   :  { %789 = vmax.xlane.f32.xlu1 %v2067_v35  ;;  %v753_v56 = vsel %vm721_vm15, %v705_v57, %v737_v36 }
 0x1f5   :  { %437 = vmax.xlane.f32.xlu0 %v2072_v34  ;;  %v2112_v45 = vsel %vm129_vm13, %v753_v56, -1e+30  ;;  %v689_v2 = vpop.xlane.xlu1 %688 }
 0x1f6   :  { %1087 = vmatpush.xpose.msrb.mxu2 %v1720_v38  ;;  %v384_v38 = vmul.f32 0.2, %v352_v61  ;;  %v708_v9 = vadd.f32 %v1724_v17, %v689_v2 }
 0x1f8   :  { %v400_v30 = vsel %vm368_vm7, %v352_v61, %v384_v38  ;;  %v740_v7 = vmul.f32 0.2, %v708_v9  ;;  %vm724_vm11 = vcmp.gt.f32.partialorder %v708_v9, 0.0 }
 0x1f9   :  { %v2118_v6 = vsel %vm1940_vm6, %v400_v30, -1e+30 }
 0x1fa   :  { %v756_v42 = vsel %vm724_vm11, %v708_v9, %v740_v7 }
 0x1fb   :  { %v2123_v40 = vsel %vm1994_vm0, %v756_v42, -1e+30 }
 0x1fc   :  { %791 = vmax.xlane.f32.xlu1 %v2088_v28 }
 0x1fd   :  { %439 = vmax.xlane.f32.xlu0 %v2093_v51  ;;  %v2126_v37 = vpop.xlane.xlu1 %690 }
 0x204   :  { %793 = vmax.xlane.f32.xlu1 %v2103_v12 }
 0x205   :  { %441 = vmax.xlane.f32.xlu0 %v2106_v60 }
 0x20c   :  { %795 = vmax.xlane.f32.xlu1 %v2112_v45 }
 0x214   :  { %443 = vmax.xlane.f32.xlu1 %v2118_v6 }
 0x21c   :  { %801 = vmax.xlane.f32.xlu1 %v2123_v40 }
 0x237   :  { %v776_v20 = vpop.xlane.xlu1 %775  ;;  %v778_v21 = vpop.xlane.xlu2 %777 }
 0x238   :  { %v807_v33 = vsub.f32 %v1764_v59, %v776_v20  ;;  %v422_v13 = vpop.xlane.xlu0 %421  ;;  %v808_v46 = vsub.f32 %v1760_v58, %v778_v21 }
 0x239   :  { %v453_v10 = vsub.f32 %v1772_v63, %v422_v13 }
 0x23a   :  { %v823_v29 = vmul.f32 1.442695, %v807_v33  ;;  %v825_v22 = vmul.f32 1.442695, %v808_v46 }
 0x23b   :  { %v469_v44 = vmul.f32 1.442695, %v453_v10 }
 0x23c   :  { %1220 = vpow2.f32 %v823_v29 }
 0x23d   :  { %1222 = vpow2.f32 %v469_v44 }
 0x23e   :  { %1224 = vpow2.f32 %v825_v22 }
 0x23f   :  { %v424_v3 = vpop.xlane.xlu1 %423  ;;  %v426_v57 = vpop.xlane.xlu2 %425 }
 0x240   :  { %v454_v48 = vsub.f32 %v1808_v16, %v424_v3  ;;  %v780_v31 = vpop.xlane.xlu0 %779  ;;  %v455_v58 = vsub.f32 %v1804_v15, %v426_v57  ;;  %v707_v3 = vadd.f32 %v1724_v17, %v2108_v5 }
 0x241   :  { %v809_v63 = vsub.f32 %v1819_v23, %v780_v31 }
 0x242   :  { %v471_v52 = vmul.f32 1.442695, %v454_v48  ;;  %v2132_v53 = vpop.eup %1220  ;;  %v473_v38 = vmul.f32 1.442695, %v455_v58  ;;  %vm723_vm0 = vcmp.gt.f32.partialorder %v707_v3, 0.0 }
 0x243   :  { %v2134_v59 = vpop.eup %1222  ;;  %855 = vadd.xlane.f32.xlu2 %v2132_v53  ;;  %v827_v16 = vmul.f32 1.442695, %v809_v63 }
 0x244   :  { %1226 = vpow2.f32 %v471_v52  ;;  %501 = vadd.xlane.f32.xlu0 %v2134_v59  ;;  %v2141_v61 = vpop.eup %1224 }
 0x245   :  { %1228 = vpow2.f32 %v827_v16 }
 0x246   :  { %1230 = vpow2.f32 %v473_v38 }
 0x247   :  { %v693_v39 = vpop.xlane.xlu1 %692  ;;  %v784_v46 = vpop.xlane.xlu2 %783 }
 0x248   :  { %v428_v36 = vpop.xlane.xlu0 %427  ;;  %v710_v56 = vadd.f32 %v1724_v17, %v693_v39 }
 0x249   :  { %v456_v30 = vsub.f32 %v1874_v26, %v428_v36 }
 0x24a   :  { %v2143_v2 = vpop.eup %1226  ;;  %v742_v23 = vmul.f32 0.2, %v710_v56  ;;  %vm726_vm6 = vcmp.gt.f32.partialorder %v710_v56, 0.0 }
 0x24b   :  { %857 = vadd.xlane.f32.xlu2 %v2141_v61  ;;  %v475_v9 = vmul.f32 1.442695, %v456_v30  ;;  %v2154_v21 = vpop.eup %1228 }
 0x24c   :  { %503 = vadd.xlane.f32.xlu0 %v2143_v2  ;;  %v758_v33 = vsel %vm726_vm6, %v710_v56, %v742_v23  ;;  %v2156_v29 = vpop.eup %1230 }
 0x24d   :  { %v2152_v26 = vsel %vm2025_vm5, %v758_v33, -1e+30  ;;  %1232 = vpow2.f32 %v475_v9 }
 0x24f   :  { %v782_v15 = vpop.xlane.xlu1 %781  ;;  %v432_v16 = vpop.xlane.xlu2 %431 }
 0x250   :  { %v810_v7 = vsub.f32 %v1917_v27, %v782_v15  ;;  %v786_v42 = vpop.xlane.xlu0 %785 }
 0x251   :  { %v812_v20 = vsub.f32 %v1925_v32, %v786_v42 }
 0x252   :  { %v829_v13 = vmul.f32 1.442695, %v810_v7 }
 0x253   :  { %v833_v10 = vmul.f32 1.442695, %v812_v20  ;;  %859 = vadd.xlane.f32.xlu2 %v2154_v21  ;;  %v2164_v22 = vpop.eup %1232 }
 0x254   :  { %1234 = vpow2.f32 %v829_v13  ;;  %505 = vadd.xlane.f32.xlu0 %v2156_v29 }
 0x255   :  { %1236 = vpow2.f32 %v833_v10 }
 0x257   :  { %v430_v27 = vpop.xlane.xlu1 %429 }
 0x258   :  { %v457_v32 = vsub.f32 %v1968_v55, %v430_v27  ;;  %v434_v44 = vpop.xlane.xlu0 %433  ;;  %v739_v55 = vmul.f32 0.2, %v707_v3 }
 0x259   :  { %v459_v43 = vsub.f32 %v2012_v8, %v434_v44  ;;  %v811_v8 = vsub.f32 %v1863_v50, %v784_v46  ;;  %v458_v50 = vsub.f32 %v1913_v14, %v432_v16 }
 0x25a   :  { %v477_v48 = vmul.f32 1.442695, %v457_v32  ;;  %v2166_v31 = vpop.eup %1234  ;;  %v755_v58 = vsel %vm723_vm0, %v707_v3, %v739_v55 }
 0x25b   :  { %v481_v52 = vmul.f32 1.442695, %v459_v43  ;;  %v2168_v57 = vpop.eup %1236  ;;  %861 = vadd.xlane.f32.xlu2 %v2166_v31  ;;  %v831_v39 = vmul.f32 1.442695, %v811_v8  ;;  %v2181_v38 = vsel %vm1954_vm9, %v755_v58, -1e+30 }
 0x25c   :  { %1238 = vpow2.f32 %v477_v48  ;;  %507 = vadd.xlane.f32.xlu0 %v2164_v22  ;;  %865 = vadd.xlane.f32.xlu1 %v2168_v57  ;;  %v479_v7 = vmul.f32 1.442695, %v458_v50 }
 0x25d   :  { %1240 = vpow2.f32 %v481_v52 }
 0x25e   :  { %1242 = vpow2.f32 %v831_v39 }
 0x25f   :  { %v788_v5 = vpop.xlane.xlu1 %787 }
 0x260   :  { %v436_v63 = vpop.xlane.xlu0 %435  ;;  %v813_v30 = vsub.f32 %v2045_v62, %v788_v5 }
 0x261   :  { %v460_v49 = vsub.f32 %v2050_v47, %v436_v63 }
 0x262   :  { %v2174_v36 = vpop.eup %1238  ;;  %v835_v9 = vmul.f32 1.442695, %v813_v30 }
 0x263   :  { %v2176_v56 = vpop.eup %1240  ;;  %509 = vadd.xlane.f32.xlu2 %v2174_v36  ;;  %v483_v14 = vmul.f32 1.442695, %v460_v49 }
 0x264   :  { %799 = vmax.xlane.f32.xlu0 %v2181_v38  ;;  %513 = vadd.xlane.f32.xlu1 %v2176_v56  ;;  %v2187_v42 = vpop.eup %1242  ;;  %1244 = vpow2.f32 %v835_v9 }
 0x265   :  { %1246 = vpow2.f32 %v479_v7  ;;  %v798_v7 = vpop.xlane.xlu2 %797 }
 0x266   :  { %v818_v49 = vsub.f32 %v1964_v54, %v798_v7 }
 0x267   :  { %v790_v23 = vpop.xlane.xlu1 %789 }
 0x268   :  { %v438_v15 = vpop.xlane.xlu0 %437  ;;  %v814_v47 = vsub.f32 %v2067_v35, %v790_v23 }
 0x269   :  { %v461_v35 = vsub.f32 %v2072_v34, %v438_v15 }
 0x26a   :  { %v2194_v10 = vpop.eup %1244  ;;  %v837_v3 = vmul.f32 1.442695, %v814_v47 }
 0x26b   :  { %445 = vmax.xlane.f32.xlu2 %v2000_v4  ;;  %v2196_v27 = vpop.eup %1246  ;;  %v485_v8 = vmul.f32 1.442695, %v461_v35 }
 0x26c   :  { %863 = vadd.xlane.f32.xlu0 %v2187_v42  ;;  %449 = vmax.xlane.f32.xlu1 %v2016_v11 }
 0x26f   :  { %v792_v62 = vpop.xlane.xlu1 %791 }
 0x270   :  { %v815_v20 = vsub.f32 %v2088_v28, %v792_v62  ;;  %v440_v33 = vpop.xlane.xlu0 %439  ;;  %v709_v28 = vadd.f32 %v1724_v17, %v2126_v37  ;;  %v845_v62 = vmul.f32 1.442695, %v818_v49 }
 0x271   :  { %v462_v32 = vsub.f32 %v2093_v51, %v440_v33 }
 0x272   :  { %v839_v13 = vmul.f32 1.442695, %v815_v20  ;;  %v741_v51 = vmul.f32 0.2, %v709_v28  ;;  %vm725_vm9 = vcmp.gt.f32.partialorder %v709_v28, 0.0 }
 0x273   :  { %867 = vadd.xlane.f32.xlu2 %v2194_v10  ;;  %v487_v46 = vmul.f32 1.442695, %v462_v32 }
 0x274   :  { %1248 = vpow2.f32 %v839_v13  ;;  %511 = vadd.xlane.f32.xlu0 %v2196_v27  ;;  %v757_v37 = vsel %vm725_vm9, %v709_v28, %v741_v51 }
 0x275   :  { %1250 = vpow2.f32 %v483_v14  ;;  %v2217_v63 = vsel %vm1986_vm14, %v757_v37, -1e+30  ;;  %vm2533_vm14 = vcmp.lt.s32.totalorder %v1540_v19, 8 }
 0x276   :  { %1252 = vpow2.f32 %v487_v46  ;;  %vm2534_vm5 = vmmov %vm2533_vm14 }
 0x277   :  { %v794_v44 = vpop.xlane.xlu1 %793  ;;  %1254 = vpow2.f32 %v837_v3  ;;  %vm2535_vm10 = vmmov %vm2534_vm5 }
 0x278   :  { %v816_v34 = vsub.f32 %v2103_v12, %v794_v44  ;;  %v442_v30 = vpop.xlane.xlu0 %441  ;;  %vm2536_vm12 = vmmov %vm2534_vm5 }
 0x279   :  { %v463_v12 = vsub.f32 %v2106_v60, %v442_v30  ;;  %vm2537_vm1 = vmmov %vm2534_vm5 }
 0x27a   :  { %v2204_v43 = vpop.eup %1248  ;;  %vm2538_vm8 = vmmov %vm2537_vm1 }
 0x27b   :  { %v2206_v48 = vpop.eup %1250  ;;  %871 = vadd.xlane.f32.xlu1 %v2204_v43  ;;  %v489_v15 = vmul.f32 1.442695, %v463_v12  ;;  %vm2539_vm2 = vmmov %vm2537_vm1 }
 0x27c   :  { %515 = vadd.xlane.f32.xlu2 %v2206_v48  ;;  %447 = vmax.xlane.f32.xlu0 %v2021_v41  ;;  %v2213_v55 = vpop.eup %1252  ;;  %vm2540_vm3 = vmmov %vm2537_vm1 }
 0x27d   :  { %v2220_v58 = vpop.eup %1254  ;;  %vm2541_vm13 = vmmov %vm2537_vm1 }
 0x27e   :  { %vm2542_vm15 = vmmov %vm2537_vm1 }
 0x27f   :  { %v796_v52 = vpop.xlane.xlu1 %795  ;;  %vm2543_vm7 = vmmov %vm2537_vm1 }
 0x280   :  { %v817_v17 = vsub.f32 %v2112_v45, %v796_v52  ;;  %v841_v45 = vmul.f32 1.442695, %v816_v34  ;;  %vm2544_vm11 = vmmov %vm2537_vm1 }
 0x281   :  { %vm2545_vm6 = vmmov %vm2537_vm1 }
 0x282   :  { %v843_v5 = vmul.f32 1.442695, %v817_v17  ;;  %vm2546_vm0 = vmmov %vm2537_vm1 }
 0x283   :  { %519 = vadd.xlane.f32.xlu1 %v2213_v55  ;;  %vm2547_vm9 = vmmov %vm2546_vm0 }
 0x284   :  { %1256 = vpow2.f32 %v843_v5  ;;  %803 = vmax.xlane.f32.xlu2 %v2217_v63  ;;  %869 = vadd.xlane.f32.xlu0 %v2220_v58 }
 0x285   :  { %1258 = vpow2.f32 %v485_v8 }
 0x286   :  { %1260 = vpow2.f32 %v841_v45 }
 0x287   :  { %v444_v16 = vpop.xlane.xlu1 %443 }
 0x288   :  { %v464_v50 = vsub.f32 %v2118_v6, %v444_v16 }
 0x28a   :  { %v2225_v39 = vpop.eup %1256  ;;  %v491_v23 = vmul.f32 1.442695, %v464_v50 }
 0x28b   :  { %875 = vadd.xlane.f32.xlu1 %v2225_v39  ;;  %v2228_v0 = vpop.eup %1258 }
 0x28c   :  { %451 = vmax.xlane.f32.xlu2 %v2034_v1  ;;  %517 = vadd.xlane.f32.xlu0 %v2228_v0  ;;  %v2234_v9 = vpop.eup %1260  ;;  %1262 = vpow2.f32 %v491_v23 }
 0x28d   :  { %1264 = vpow2.f32 %v489_v15 }
 0x28e   :  { %1266 = vpow2.f32 %v845_v62 }
 0x28f   :  { %v802_v52 = vpop.xlane.xlu1 %801 }
 0x292   :  { %v2239_v20 = vpop.eup %1262 }
 0x293   :  { %v2241_v6 = vpop.eup %1264 }
 0x294   :  { %873 = vadd.xlane.f32.xlu2 %v2234_v9  ;;  %805 = vmax.xlane.f32.xlu0 %v2152_v26  ;;  %v2245_v60 = vpop.eup %1266 }
 0x29c   :  { %523 = vadd.xlane.f32.xlu2 %v2239_v20  ;;  %521 = vadd.xlane.f32.xlu0 %v2241_v6 }
 0x2a4   :  { %877 = vadd.xlane.f32.xlu0 %v2245_v60 }
 0x2b6   :  { %v856_v14 = vpop.xlane.xlu2 %855 }
 0x2b7   :  { %1268 = vrcp.f32 %v856_v14  ;;  %v502_v33 = vpop.xlane.xlu0 %501 }
 0x2b8   :  { %1270 = vrcp.f32 %v502_v33 }
 0x2bd   :  { %v1269_v54 = vpop.eup %1268 }
 0x2be   :  { %v1271_v13 = vpop.eup %1270  ;;  %v858_v32 = vpop.xlane.xlu2 %857  ;;  %v903_v47 = vmul.f32 %v1269_v54, %v2132_v53 }
 0x2bf   :  { %1272 = vrcp.f32 %v858_v32  ;;  %v504_v44 = vpop.xlane.xlu0 %503  ;;  %v549_v46 = vmul.f32 %v1271_v13, %v2134_v59 }
 0x2c0   :  { %1274 = vrcp.f32 %v504_v44  ;;  %935 = vmatmul.f32.vlgmr.msra.gmra.mxu3 %v903_v47 }
 0x2c1   :  { %581 = vmatmul.f32.vlgmr.msra.gmra.mxu2 %v549_v46 }
 0x2c5   :  { %v1273_v28 = vpop.eup %1272 }
 0x2c6   :  { %v1275_v3 = vpop.eup %1274  ;;  %v860_v51 = vpop.xlane.xlu2 %859  ;;  %v904_v35 = vmul.f32 %v1273_v28, %v2141_v61 }
 0x2c7   :  { %1276 = vrcp.f32 %v860_v51  ;;  %v506_v17 = vpop.xlane.xlu0 %505  ;;  %v550_v37 = vmul.f32 %v1275_v3, %v2143_v2 }
 0x2c8   :  { %1278 = vrcp.f32 %v506_v17  ;;  %938 = vmatmul.f32.gmra.mxu3 %v904_v35 }
 0x2c9   :  { %584 = vmatmul.f32.gmra.mxu2 %v550_v37 }
 0x2cd   :  { %v1277_v53 = vpop.eup %1276 }
 0x2ce   :  { %v1279_v8 = vpop.eup %1278  ;;  %v862_v5 = vpop.xlane.xlu2 %861  ;;  %v905_v59 = vmul.f32 %v1277_v53, %v2154_v21 }
 0x2cf   :  { %1280 = vrcp.f32 %v862_v5  ;;  %v866_v34 = vpop.xlane.xlu1 %865  ;;  %v508_v45 = vpop.xlane.xlu0 %507  ;;  %v551_v16 = vmul.f32 %v1279_v8, %v2156_v29 }
 0x2d0   :  { %941 = vmatmul.f32.gmra.mxu3 %v905_v59  ;;  %1282 = vrcp.f32 %v508_v45 }
 0x2d1   :  { %587 = vmatmul.f32.gmra.mxu2 %v551_v16 }
 0x2d5   :  { %v1281_v61 = vpop.eup %1280 }
 0x2d6   :  { %v510_v30 = vpop.xlane.xlu2 %509  ;;  %v906_v2 = vmul.f32 %v1281_v61, %v2166_v31  ;;  %v1283_v50 = vpop.eup %1282 }
 0x2d7   :  { %1284 = vrcp.f32 %v510_v30  ;;  %v514_v12 = vpop.xlane.xlu1 %513  ;;  %v800_v23 = vpop.xlane.xlu0 %799  ;;  %v552_v21 = vmul.f32 %v1283_v50, %v2164_v22  ;;  %v820_v22 = vsub.f32 %v2123_v40, %v802_v52 }
 0x2d8   :  { %v819_v15 = vsub.f32 %v2181_v38, %v800_v23  ;;  %944 = vmatmul.f32.gmra.mxu3 %v906_v2 }
 0x2d9   :  { %590 = vmatmul.f32.gmra.mxu2 %v552_v21 }
 0x2da   :  { %v847_v7 = vmul.f32 1.442695, %v819_v15 }
 0x2dc   :  { %1286 = vpow2.f32 %v847_v7 }
 0x2dd   :  { %v1285_v29 = vpop.eup %1284 }
 0x2de   :  { %v446_v49 = vpop.xlane.xlu2 %445  ;;  %v553_v62 = vmul.f32 %v1285_v29, %v2174_v36 }
 0x2df   :  { %v465_v14 = vsub.f32 %v2000_v4, %v446_v49  ;;  %v450_v33 = vpop.xlane.xlu1 %449  ;;  %v864_v31 = vpop.xlane.xlu0 %863  ;;  %v849_v4 = vmul.f32 1.442695, %v820_v22 }
 0x2e0   :  { %v467_v54 = vsub.f32 %v2016_v11, %v450_v33  ;;  %1288 = vrcp.f32 %v864_v31 }
 0x2e1   :  { %v493_v13 = vmul.f32 1.442695, %v465_v14  ;;  %593 = vmatmul.f32.gmra.mxu2 %v553_v62 }
 0x2e2   :  { %v2260_v32 = vpop.eup %1286  ;;  %v497_v38 = vmul.f32 1.442695, %v467_v54 }
 0x2e3   :  { %1290 = vpow2.f32 %v493_v13  ;;  %879 = vadd.xlane.f32.xlu2 %v2260_v32 }
 0x2e4   :  { %1292 = vpow2.f32 %v497_v38 }
 0x2e5   :  { %1294 = vrcp.f32 %v866_v34 }
 0x2e6   :  { %v1289_v47 = vpop.eup %1288  ;;  %v868_v36 = vpop.xlane.xlu2 %867 }
 0x2e7   :  { %v512_v44 = vpop.xlane.xlu0 %511  ;;  %v907_v46 = vmul.f32 %v1289_v47, %v2187_v42 }
 0x2e8   :  { %1296 = vrcp.f32 %v512_v44 }
 0x2e9   :  { %v2265_v11 = vpop.eup %1290  ;;  %947 = vmatmul.f32.gmra.mxu3 %v907_v46  ;;  %1298 = vpow2.f32 %v849_v4 }
 0x2ea   :  { %v2267_v28 = vpop.eup %1292  ;;  %525 = vadd.xlane.f32.xlu1 %v2265_v11  ;;  %1300 = vrcp.f32 %v514_v12 }
 0x2eb   :  { %529 = vadd.xlane.f32.xlu2 %v2267_v28  ;;  %v1295_v40 = vpop.eup %1294  ;;  %1302 = vrcp.f32 %v868_v36 }
 0x2ec   :  { %v908_v42 = vmul.f32 %v1295_v40, %v2168_v57 }
 0x2ee   :  { %v1297_v3 = vpop.eup %1296  ;;  %v872_v34 = vpop.xlane.xlu1 %871 }
 0x2ef   :  { %v516_v51 = vpop.xlane.xlu2 %515  ;;  %v448_v35 = vpop.xlane.xlu0 %447  ;;  %v554_v52 = vmul.f32 %v1297_v3, %v2196_v27 }
 0x2f0   :  { %v466_v17 = vsub.f32 %v2021_v41, %v448_v35  ;;  %v2274_v37 = vpop.eup %1298 }
 0x2f1   :  { %596 = vmatmul.f32.gmra.mxu2 %v554_v52  ;;  %950 = vmatmul.f32.gmra.mxu3 %v908_v42  ;;  %v1301_v8 = vpop.eup %1300 }
 0x2f2   :  { %v495_v53 = vmul.f32 1.442695, %v466_v17  ;;  %881 = vadd.xlane.f32.xlu1 %v2274_v37  ;;  %v1303_v5 = vpop.eup %1302  ;;  %v555_v57 = vmul.f32 %v1301_v8, %v2176_v56 }
 0x2f3   :  { %v909_v41 = vmul.f32 %v1303_v5, %v2194_v10 }
 0x2f4   :  { %1304 = vpow2.f32 %v495_v53 }
 0x2f5   :  { %1306 = vrcp.f32 %v516_v51 }
 0x2f6   :  { %v520_v15 = vpop.xlane.xlu1 %519 }
 0x2f7   :  { %v804_v59 = vpop.xlane.xlu2 %803  ;;  %v870_v27 = vpop.xlane.xlu0 %869 }
 0x2f8   :  { %v821_v45 = vsub.f32 %v2217_v63, %v804_v59  ;;  %1308 = vrcp.f32 %v870_v27 }
 0x2f9   :  { %599 = vmatmul.f32.gmra.mxu2 %v555_v57  ;;  %953 = vmatmul.f32.gmra.mxu3 %v909_v41 }
 0x2fa   :  { %v851_v16 = vmul.f32 1.442695, %v821_v45  ;;  %v2280_v61 = vpop.eup %1304 }
 0x2fb   :  { %527 = vadd.xlane.f32.xlu0 %v2280_v61  ;;  %v1307_v30 = vpop.eup %1306 }
 0x2fc   :  { %1310 = vpow2.f32 %v851_v16  ;;  %v556_v56 = vmul.f32 %v1307_v30, %v2206_v48 }
 0x2fd   :  { %1312 = vrcp.f32 %v872_v34 }
 0x2fe   :  { %v1309_v2 = vpop.eup %1308  ;;  %v876_v31 = vpop.xlane.xlu1 %875 }
 0x2ff   :  { %v452_v50 = vpop.xlane.xlu2 %451  ;;  %v518_v12 = vpop.xlane.xlu0 %517  ;;  %v910_v10 = vmul.f32 %v1309_v2, %v2220_v58 }
 0x300   :  { %v468_v63 = vsub.f32 %v2034_v1, %v452_v50  ;;  %1314 = vrcp.f32 %v518_v12 }
 0x301   :  { %602 = vmatmul.f32.gmra.mxu2 %v556_v56  ;;  %956 = vmatmul.f32.gmra.mxu3 %v910_v10 }
 0x302   :  { %v2286_v23 = vpop.eup %1310  ;;  %v499_v21 = vmul.f32 1.442695, %v468_v63 }
 0x303   :  { %883 = vadd.xlane.f32.xlu0 %v2286_v23  ;;  %v1313_v7 = vpop.eup %1312 }
 0x304   :  { %1316 = vpow2.f32 %v499_v21  ;;  %v911_v58 = vmul.f32 %v1313_v7, %v2204_v43 }
 0x305   :  { %1318 = vrcp.f32 %v520_v15 }
 0x306   :  { %v1315_v29 = vpop.eup %1314 }
 0x307   :  { %v874_v49 = vpop.xlane.xlu2 %873  ;;  %v806_v1 = vpop.xlane.xlu0 %805  ;;  %v557_v48 = vmul.f32 %v1315_v29, %v2228_v0 }
 0x308   :  { %1320 = vrcp.f32 %v874_v49  ;;  %v822_v62 = vsub.f32 %v2152_v26, %v806_v1 }
 0x309   :  { %605 = vmatmul.f32.gmra.mxu2 %v557_v48  ;;  %959 = vmatmul.f32.gmra.mxu3 %v911_v58 }
 0x30a   :  { %v2292_v14 = vpop.eup %1316  ;;  %v853_v33 = vmul.f32 1.442695, %v822_v62 }
 0x30b   :  { %531 = vadd.xlane.f32.xlu1 %v2292_v14  ;;  %v1319_v54 = vpop.eup %1318 }
 0x30c   :  { %1322 = vpow2.f32 %v853_v33  ;;  %v558_v0 = vmul.f32 %v1319_v54, %v2213_v55 }
 0x30d   :  { %1324 = vrcp.f32 %v876_v31 }
 0x30e   :  { %v1321_v13 = vpop.eup %1320 }
 0x30f   :  { %v912_v38 = vmul.f32 %v1321_v13, %v2234_v9  ;;  %v522_v22 = vpop.xlane.xlu0 %521  ;;  %v524_v43 = vpop.xlane.xlu2 %523 }
 0x310   :  { %1326 = vrcp.f32 %v522_v22 }
 0x311   :  { %608 = vmatmul.f32.gmra.mxu2 %v558_v0  ;;  %962 = vmatmul.f32.gmra.mxu3 %v912_v38  ;;  %1328 = vrcp.f32 %v524_v43 }
 0x312   :  { %v2297_v26 = vpop.eup %1322 }
 0x313   :  { %885 = vadd.xlane.f32.xlu2 %v2297_v26  ;;  %v1325_v47 = vpop.eup %1324 }
 0x314   :  { %v913_v46 = vmul.f32 %v1325_v47, %v2225_v39 }
 0x316   :  { %v1327_v36 = vpop.eup %1326 }
 0x317   :  { %v878_v4 = vpop.xlane.xlu0 %877  ;;  %v559_v44 = vmul.f32 %v1327_v36, %v2241_v6  ;;  %v1329_v55 = vpop.eup %1328 }
 0x318   :  { %1330 = vrcp.f32 %v878_v4  ;;  %v560_v40 = vmul.f32 %v1329_v55, %v2239_v20 }
 0x319   :  { %611 = vmatmul.f32.gmra.mxu2 %v559_v44  ;;  %965 = vmatmul.f32.gmra.mxu3 %v913_v46 }
 0x31e   :  { %v1331_v9 = vpop.eup %1330 }
 0x31f   :  { %v914_v3 = vmul.f32 %v1331_v9, %v2245_v60 }
 0x321   :  { %614 = vmatmul.f32.gmra.mxu2 %v560_v40  ;;  %968 = vmatmul.f32.gmra.mxu3 %v914_v3 }
 0x343   :  { %v2304_v51 = vpop.f32.mrf.mxu3 }
 0x344   :  { %v582_v35 = vpop.f32.mrf.mxu2 }
 0x345   :  { %v2308_v52 = vsel %vm2533_vm14, %v582_v35, 0.0  ;;  %vm2548_vm14 = vmmov %vm2546_vm0 }
 0x346   :  { %v984_v39 = vsel %vm1556_vm4, %v2304_v51, %v2308_v52  ;;  %v1098_v51 = vmul.u32 8, %v1705_v24 }
 0x34b   :  { %v2314_v6 = vpop.f32.mrf.mxu3 }
 0x34c   :  { %v585_v42 = vpop.f32.mrf.mxu2 }
 0x34d   :  { %v2318_v20 = vsel %vm2534_vm5, %v585_v42, 0.0  ;;  %vm2549_vm5 = vcmp.eq.s32.totalorder %v1705_v24, %v1540_v19 }
 0x34e   :  { %v985_v60 = vsel %vm1556_vm4, %v2314_v6, %v2318_v20  ;;  %v1439_v6 = vmov 1.0   ;;  %v1102_v20 = vadd.s32 8, %v1098_v51 }
 0x353   :  { %v2324_v17 = vpop.f32.mrf.mxu3 }
 0x354   :  { %v588_v53 = vpop.f32.mrf.mxu2 }
 0x355   :  { %v2328_v8 = vsel %vm2535_vm10, %v588_v53, 0.0  ;;  %vm1101_vm10 = vcmp.ge.s32.totalorder %v1540_v19, %v1099_v25 }
 0x356   :  { %v986_v5 = vsel %vm1556_vm4, %v2324_v17, %v2328_v8  ;;  %v880_v59 = vpop.xlane.xlu2 %879  ;;  %v1438_v17 = vmov 0  }
 0x357   :  { %1332 = vrcp.f32 %v880_v59  ;;  %1219 = vset.pattern.permute.xlu0 %v1438_v17 }
 0x35b   :  { %v2334_v34 = vpop.f32.mrf.mxu3 }
 0x35c   :  { %v591_v27 = vpop.f32.mrf.mxu2 }
 0x35d   :  { %v1333_v45 = vpop.eup %1332  ;;  %v526_v57 = vpop.xlane.xlu1 %525  ;;  %v2338_v41 = vsel %vm2536_vm12, %v591_v27, 0.0 }
 0x35e   :  { %1334 = vrcp.f32 %v526_v57  ;;  %v915_v16 = vmul.f32 %v1333_v45, %v2260_v32  ;;  %v987_v30 = vsel %vm1556_vm4, %v2334_v34, %v2338_v41 }
 0x360   :  { %971 = vmatmul.f32.gmra.mxu3 %v915_v16 }
 0x364   :  { %v1335_v2 = vpop.eup %1334  ;;  %v594_v12 = vpop.f32.mrf.mxu2 }
 0x365   :  { %v882_v50 = vpop.xlane.xlu1 %881  ;;  %v561_v63 = vmul.f32 %v1335_v2, %v2265_v11  ;;  %v2348_v10 = vsel %vm2537_vm1, %v594_v12, 0.0  ;;  %v530_v11 = vpop.xlane.xlu2 %529  ;;  %vm1100_vm1 = vcmp.ge.s32.totalorder %v1540_v19, %v1098_v51 }
 0x366   :  { %1336 = vrcp.f32 %v882_v50 }
 0x367   :  { %617 = vmatmul.f32.gmra.mxu2 %v561_v63 }
 0x36c   :  { %v1337_v56 = vpop.eup %1336  ;;  %v2350_v15 = vpop.f32.mrf.mxu3 }
 0x36d   :  { %v988_v32 = vsel %vm1556_vm4, %v2350_v15, %v2348_v10  ;;  %v916_v21 = vmul.f32 %v1337_v56, %v2274_v37 }
 0x36e   :  { %v528_v7 = vpop.xlane.xlu0 %527 }
 0x36f   :  { %1338 = vrcp.f32 %v528_v7  ;;  %974 = vmatmul.f32.gmra.mxu3 %v916_v21 }
 0x370   :  { %1340 = vrcp.f32 %v530_v11 }
 0x374   :  { %v597_v29 = vpop.f32.mrf.mxu2  ;;  %v2357_v49 = vpop.f32.mrf.mxu3 }
 0x375   :  { %v1339_v1 = vpop.eup %1338  ;;  %v2361_v48 = vsel %vm2538_vm8, %v597_v29, 0.0  ;;  %vm1104_vm8 = vcmp.lt.s32.totalorder %v1540_v19, %v1102_v20 }
 0x376   :  { %v989_v58 = vsel %vm1556_vm4, %v2357_v49, %v2361_v48  ;;  %v884_v62 = vpop.xlane.xlu0 %883  ;;  %v562_v37 = vmul.f32 %v1339_v1, %v2280_v61  ;;  %v1341_v33 = vpop.eup %1340 }
 0x377   :  { %1342 = vrcp.f32 %v884_v62  ;;  %v563_v61 = vmul.f32 %v1341_v33, %v2267_v28  ;;  %v2404_v62 = vld [vmem:[#allocation2 + $0x8] sm:$0xff] }
 0x378   :  { %620 = vmatmul.f32.gmra.mxu2 %v562_v37  ;;  %v1000_v37 = vperm.slane %v2404_v62, 3  ;;  %v1047_v41 = vrot.slane %v2404_v62, 4  ;;  %1093 = vperm.xlu0 %1219, %v2404_v62  }
 0x37a   :  { %v1003_v49 = vadd.f32 %v1000_v37, %v986_v5  ;;  %v1002_v10 = vadd.f32 %v1000_v37, %v985_v60  ;;  %v1001_v34 = vadd.f32 %v1000_v37, %v984_v39  ;;  %v1103_v39 = vadd.s32 8, %v1099_v25 }
 0x37c   :  { %v600_v31 = vpop.f32.mrf.mxu2  ;;  %v2368_v54 = vpop.f32.mrf.mxu3  ;;  %vm1105_vm12 = vcmp.lt.s32.totalorder %v1540_v19, %v1103_v39 }
 0x37d   :  { %v1343_v13 = vpop.eup %1342  ;;  %v2372_v38 = vsel %vm2539_vm2, %v600_v31, 0.0  ;;  %vm1107_vm2 = vmand %vm1101_vm10, %vm1105_vm12 }
 0x37e   :  { %v532_v22 = vpop.xlane.xlu1 %531  ;;  %v990_v0 = vsel %vm1556_vm4, %v2368_v54, %v2372_v38  ;;  %v917_v43 = vmul.f32 %v1343_v13, %v2286_v23  ;;  %v1004_v54 = vadd.f32 %v1000_v37, %v987_v30 }
 0x37f   :  { %1344 = vrcp.f32 %v532_v22 }
 0x380   :  { %623 = vmatmul.f32.gmra.mxu2 %v563_v61  ;;  %977 = vmatmul.f32.gmra.mxu3 %v917_v43 }
 0x384   :  { %v603_v36 = vpop.f32.mrf.mxu2  ;;  %v2380_v4 = vpop.f32.mrf.mxu3 }
 0x385   :  { %v1345_v47 = vpop.eup %1344  ;;  %v2384_v44 = vsel %vm2540_vm3, %v603_v36, 0.0  ;;  %vm1106_vm3 = vmand %vm1100_vm1, %vm1104_vm8 }
 0x386   :  { %v564_v46 = vmul.f32 %v1345_v47, %v2292_v14  ;;  %v991_v55 = vsel %vm1556_vm4, %v2380_v4, %v2384_v44  ;;  %v886_v28 = vpop.xlane.xlu2 %885  ;;  %v1005_v4 = vadd.f32 %v1000_v37, %v988_v32 }
 0x387   :  { %1346 = vrcp.f32 %v886_v28 }
 0x388   :  { %626 = vmatmul.f32.gmra.mxu2 %v564_v46 }
 0x38c   :  { %v606_v23 = vpop.f32.mrf.mxu2  ;;  %v960_v9 = vpop.f32.mrf.mxu3 }
 0x38d   :  { %v1347_v40 = vpop.eup %1346  ;;  %v638_v3 = vsel %vm2541_vm13, %v606_v23, 0.0  ;;  %vm1152_vm13 = vcmask 130048  }
 0x38e   :  { %v992_v35 = vsel %vm1556_vm4, %v960_v9, %v638_v3  ;;  %v918_v42 = vmul.f32 %v1347_v40, %v2297_v26 }
 0x390   :  { %980 = vmatmul.f32.gmra.mxu3 %v918_v42 }
 0x394   :  { %v609_v14 = vpop.f32.mrf.mxu2  ;;  %v963_v53 = vpop.f32.mrf.mxu3 }
 0x395   :  { %v639_v59 = vsel %vm2542_vm15, %v609_v14, 0.0 }
 0x396   :  { %v993_v45 = vsel %vm1556_vm4, %v963_v53, %v639_v59  ;;  %v1009_v59 = vadd.f32 %v1000_v37, %v992_v35  ;;  %v1006_v35 = vadd.f32 %v1000_v37, %v989_v58 }
 0x397   :  { %v1010_v53 = vadd.f32 %v1000_v37, %v993_v45 }
 0x39c   :  { %v612_v27 = vpop.f32.mrf.mxu2  ;;  %v966_v57 = vpop.f32.mrf.mxu3 }
 0x39d   :  { %v640_v40 = vsel %vm2548_vm14, %v612_v27, 0.0  ;;  %v1008_v27 = vadd.f32 %v1000_v37, %v991_v55 }
 0x39e   :  { %v994_v42 = vsel %vm1556_vm4, %v966_v57, %v640_v40  ;;  %v1007_v57 = vadd.f32 %v1000_v37, %v990_v0 }
 0x39f   :  { %v1011_v14 = vadd.f32 %v1000_v37, %v994_v42 }
 0x3a4   :  { %v615_v16 = vpop.f32.mrf.mxu2  ;;  %v969_v2 = vpop.f32.mrf.mxu3 }
 0x3a5   :  { %v641_v28 = vsel %vm2547_vm9, %v615_v16, 0.0 }
 0x3a6   :  { %v995_v9 = vsel %vm1556_vm4, %v969_v2, %v641_v28 }
 0x3a7   :  { %v1012_v3 = vadd.f32 %v1000_v37, %v995_v9 }
 0x3e3   :  { %v972_v63 = vpop.f32.mrf.mxu3 }
 0x3ea   :  { %v618_v50 = vpop.f32.mrf.mxu2  ;;  %v1094_v52 = vpop.permute.xlu0 %1093 }
 0x3eb   :  { %v642_v47 = vsel %vm2546_vm0, %v618_v50, 0.0  ;;  %v1095_v5 = vrot.slane %v1094_v52, 6 }
 0x3ec   :  { %v996_v46 = vsel %vm1556_vm4, %v972_v63, %v642_v47 }
 0x3ed   :  { %v1013_v23 = vadd.f32 %v1000_v37, %v996_v46 }
 0x3f2   :  { %v975_v56 = vpop.f32.mrf.mxu3 }
 0x3fb   :  { %v621_v12 = vpop.f32.mrf.mxu2 }
 0x3fc   :  { %v643_v22 = vsel %vm2545_vm6, %v621_v12, 0.0 }
 0x3fd   :  { %v997_v43 = vsel %vm1556_vm4, %v975_v56, %v643_v22 }
 0x3fe   :  { %v1014_v36 = vadd.f32 %v1000_v37, %v997_v43 }
 0x403   :  { %v624_v21 = vpop.f32.mrf.mxu2  ;;  %v978_v7 = vpop.f32.mrf.mxu3 }
 0x404   :  { %v644_v11 = vsel %vm2543_vm7, %v624_v21, 0.0 }
 0x405   :  { %v998_v13 = vsel %vm1556_vm4, %v978_v7, %v644_v11 }
 0x406   :  { %v1015_v61 = vadd.f32 %v1000_v37, %v998_v13 }
 0x40b   :  { %v627_v26 = vpop.f32.mrf.mxu2 }
 0x40c   :  { %v645_v29 = vsel %vm2544_vm11, %v627_v26, 0.0 }
 0x413   :  { %v981_v1 = vpop.f32.mrf.mxu3 }
 0x414   :  { %v999_v33 = vsel %vm1556_vm4, %v981_v1, %v645_v29  ;;  %vm2550_vm4 = vcmp.eq.s32.totalorder %v1708_v18, %v1540_v19 }
 0x415   :  { %v1016_v31 = vadd.f32 %v1000_v37, %v999_v33 }
 0x417   :  { %1021 = vmatpush.xpose.msrb.mxu1 %v1016_v31  ;;  %1049 = vmatpush.xpose.msrb.mxu0 %v1016_v31 }
 0x41b   :  { %1022 = vmatpush.xpose.msrb.mxu1 %v1015_v61  ;;  %1050 = vmatpush.xpose.msrb.mxu0 %v1015_v61 }
 0x41f   :  { %1023 = vmatpush.xpose.msrb.mxu1 %v1014_v36  ;;  %1051 = vmatpush.xpose.msrb.mxu0 %v1014_v36 }
 0x423   :  { %1024 = vmatpush.xpose.msrb.mxu1 %v1013_v23  ;;  %1052 = vmatpush.xpose.msrb.mxu0 %v1013_v23 }
 0x427   :  { %1025 = vmatpush.xpose.msrb.mxu1 %v1012_v3  ;;  %1053 = vmatpush.xpose.msrb.mxu0 %v1012_v3 }
 0x42b   :  { %1026 = vmatpush.xpose.msrb.mxu1 %v1011_v14  ;;  %1054 = vmatpush.xpose.msrb.mxu0 %v1011_v14 }
 0x42f   :  { %1027 = vmatpush.xpose.msrb.mxu1 %v1010_v53  ;;  %1055 = vmatpush.xpose.msrb.mxu0 %v1010_v53 }
 0x433   :  { %1028 = vmatpush.xpose.msrb.mxu1 %v1009_v59  ;;  %1056 = vmatpush.xpose.msrb.mxu0 %v1009_v59 }
 0x437   :  { %1029 = vmatpush.xpose.msrb.mxu1 %v1008_v27  ;;  %1057 = vmatpush.xpose.msrb.mxu0 %v1008_v27 }
 0x43b   :  { %1030 = vmatpush.xpose.msrb.mxu1 %v1007_v57  ;;  %1058 = vmatpush.xpose.msrb.mxu0 %v1007_v57 }
 0x43f   :  { %1031 = vmatpush.xpose.msrb.mxu1 %v1006_v35  ;;  %1059 = vmatpush.xpose.msrb.mxu0 %v1006_v35 }
 0x443   :  { %1032 = vmatpush.xpose.msrb.mxu1 %v1005_v4  ;;  %1060 = vmatpush.xpose.msrb.mxu0 %v1005_v4 }
 0x447   :  { %1033 = vmatpush.xpose.msrb.mxu1 %v1004_v54  ;;  %1061 = vmatpush.xpose.msrb.mxu0 %v1004_v54 }
 0x44b   :  { %1034 = vmatpush.xpose.msrb.mxu1 %v1003_v49  ;;  %1062 = vmatpush.xpose.msrb.mxu0 %v1003_v49 }
 0x44f   :  { %1035 = vmatpush.xpose.msrb.mxu1 %v1002_v10  ;;  %1063 = vmatpush.xpose.msrb.mxu0 %v1002_v10 }
 0x453   :  { %1036 = vmatpush.xpose.msrb.mxu1 %v1001_v34  ;;  %1064 = vmatpush.xpose.msrb.mxu0 %v1001_v34 }
 0x456   :  { %1065 = vmatmul.f32.vlgmr.msrb.gmra.mxu0 %v1047_v41  ;;  %1210 = vmatmul.msk.f32.vlgmr.msrb.gmra.mxu1 %vm2549_vm5, %v1439_v6 }
 0x45e   :  { %1211 = vmatmul.msk.f32.gmra.mxu1 %vm2550_vm4, %v1439_v6 }
 0x4d3   :  { %v1066_v8 = vpop.f32.mrf.mxu0  ;;  %v1038_v58 = vpop.f32.mrf.mxu1 }
 0x4d4   :  { %1088 = vmatmul.f32.vlgmr.msrb.gmra.mxu2 %v1066_v8  ;;  %v1070_v60 = vrot.slane %v1066_v8, 1  ;;  %1044 = vst [vmem:[#allocation5] sm:$0xff] %v1038_v58 }
 0x4db   :  { %v1041_v50 = vpop.f32.mrf.mxu1 }
 0x4dc   :  { %1045 = vst [vmem:[#allocation5 + $0x8] sm:$0xff] %v1041_v50  ;;  %1143 = vmatpush.xpose.msra.mxu0 %v1041_v50 }
 0x4dd   :  { %1167 = dma.vmem_to_hbm [thread:$0]  %s1160_s10, 256, %s1162_s8, [#allocation4], %s1436_s20, %s1436_s20, %s1437_s21  }
 0x4e0   :  { %1144 = vmatpush.xpose.msra.mxu0 %v1038_v58 }
 0x557   :  { %v1089_v30 = vpop.f32.mrf.mxu2 }
 0x558   :  { %v1090_v15 = vadd.f32 %v1089_v30, %v1070_v60 }
 0x55a   :  { %v1097_v32 = vadd.f32 %v1095_v5, %v1090_v15 }
 0x55c   :  { %v1108_v18 = vperm.slane %v1097_v32, 0 }
 0x55e   :  { %v1110_v24 = vsel %vm1107_vm2, %v1108_v18, -1e+30  ;;  %v1109_v48 = vsel %vm1106_vm3, %v1108_v18, -1e+30 }
 0x55f   :  { %1113 = vmax.xlane.f32.xlu2 %v1110_v24  ;;  %1111 = vmax.xlane.f32.xlu1 %v1109_v48 }
 0x5d2   :  { %v1114_v38 = vpop.xlane.xlu2 %1113  ;;  %v1112_v0 = vpop.xlane.xlu1 %1111 }
 0x5d3   :  { %v1116_v44 = vsub.f32 %v1110_v24, %v1114_v38  ;;  %v1115_v55 = vsub.f32 %v1109_v48, %v1112_v0 }
 0x5d5   :  { %v1119_v45 = vmul.f32 1.442695, %v1116_v44  ;;  %v1117_v16 = vmul.f32 1.442695, %v1115_v55 }
 0x5d7   :  { %1348 = vpow2.f32 %v1119_v45 }
 0x5d8   :  { %1350 = vpow2.f32 %v1117_v16 }
 0x5dd   :  { %v1349_v2 = vpop.eup %1348 }
 0x5de   :  { %v1351_v19 = vpop.eup %1350  ;;  %1123 = vadd.xlane.f32.xlu2 %v1349_v2 }
 0x5df   :  { %1121 = vadd.xlane.f32.xlu1 %v1351_v19 }
 0x651   :  { %v1124_v12 = vpop.xlane.xlu2 %1123 }
 0x652   :  { %v1122_v63 = vpop.xlane.xlu1 %1121 }
 0x653   :  { %1352 = vrcp.f32 %v1122_v63 }
 0x654   :  { %1354 = vrcp.f32 %v1124_v12 }
 0x659   :  { %v1353_v56 = vpop.eup %1352 }
 0x65a   :  { %v1127_v21 = vmul.f32 %v1353_v56, %v1351_v19  ;;  %v1355_v7 = vpop.eup %1354 }
 0x65b   :  { %v1128_v26 = vmul.f32 %v1355_v7, %v1349_v2 }
 0x65c   :  { %1145 = vmatmul.f32.vlgmr.msra.gmra.mxu0 %v1127_v21 }
 0x664   :  { %1148 = vmatmul.f32.gmra.mxu0 %v1128_v26 }
 0x6d9   :  { %v1146_v11 = vpop.f32.mrf.mxu0 }
 0x6da   :  { %1153 = vst.msk [vmem:[#allocation6] sm:$0xff] %vm1152_vm13, %v1146_v11 }
 0x6e1   :  { %v1149_v29 = vpop.f32.mrf.mxu0 }
 0x6e2   :  { %1154 = vst.msk [vmem:[#allocation6 + $0x8] sm:$0xff] %vm1152_vm13, %v1149_v29 }
 0x6e3   :  { %1180 = dma.vmem_to_hbm [thread:$0]  %s1173_s12, 256, %s1175_s15, [#allocation7], %s1436_s20, %s1436_s20, %s1437_s21  }
 0x6e4   :  { %1431 = dma.done.wait [#allocation4], 256  }
 0x6e5   :  { %1432 = vsyncadd [#allocation4], 4294967040 }
 0x6e6   :  { %1433 = dma.done.wait [#allocation7], 256  }
 0x6e7   :  { %1434 = vsyncadd [#allocation7], 4294967040 }
 0x6e8   :  { %1189 = vsyncpa [#allocation3], 1 }
 0x6e9   :  { %1190 = vsyncpa [#allocation4], 1 }
 0x6ea   :  { %1191 = vsyncpa [#allocation7], 1 }

</bundles_post_ra>
